<compile_context>
chip_gen: v5e
topology: v5e:2x2
jax: 0.10.0
libtpu: 0.0.40
codegen_flags: <defaults>
</compile_context>

<pallas_src>
import functools

import jax
import jax.numpy as jnp
import numpy as np
from jax.experimental import pallas as pl
from jax.experimental.pallas import tpu as pltpu


# --------------------------------------------------------------------------
# Kernel 1: 1x1 conv_in -> packed qkv in (B, 3E, L), sequence axis minor.
# --------------------------------------------------------------------------
def _qkv_proj_kernel(x_ref, w_in_ref, qkv_ref):
    # x_ref   : (1, C, TL)   f32 input tile (channels-first)
    # w_in_ref: (3E, C)      bf16, softmax scale folded into q rows
    # qkv_ref : (1, 3E, TL)  bf16 output, lane-dense on the sequence axis
    x = x_ref[0].astype(jnp.bfloat16)                        # (C, TL)
    qkv_ref[0] = jnp.dot(
        w_in_ref[...], x, preferred_element_type=jnp.float32
    ).astype(qkv_ref.dtype)


# --------------------------------------------------------------------------
# Kernel 2: flash attention (online softmax over K/V tiles) fused with
#           conv_out + bias + residual.
# --------------------------------------------------------------------------
def _flash_attn_kernel(q_ref, k_ref, v_ref, x_ref, w_out_ref, b_out_ref,
                       o_ref, m_sc, l_sc, acc_sc):
    # q_ref    : (1, 1, heads, D, TQ) bf16 (softmax scale pre-folded)
    # k_ref    : (1, 1, heads, D, TK) bf16
    # v_ref    : (1, 1, heads, D, TK) bf16
    # x_ref    : (1, C, TQ)           f32 residual input
    # w_out_ref: (C, E)               bf16 conv_out weight (natural layout)
    # b_out_ref: (C, 1)               f32 conv_out bias
    # o_ref    : (1, C, TQ)           output (aliased with x in HBM)
    # m_sc,l_sc: (heads, 1, TQ)       f32 running max / running sum
    # acc_sc   : (heads, D, TQ)       f32 output accumulator
    ki = pl.program_id(2)

    @pl.when(ki == 0)
    def _():
        m_sc[...] = jnp.full_like(m_sc, -jnp.inf)
        l_sc[...] = jnp.zeros_like(l_sc)
        acc_sc[...] = jnp.zeros_like(acc_sc)

    q = q_ref[0, 0]                                          # (heads, D, TQ)
    k = k_ref[0, 0]                                          # (heads, D, TK)
    v = v_ref[0, 0]                                          # (heads, D, TK)

    # s[h, a, i] = sum_d k[h, d, a] * q[h, d, i]   (key axis on sublanes,
    # query axis lane-dense -> stats broadcast onto acc with no transposes)
    s = jnp.einsum('hdk,hdq->hkq', k, q,
                   preferred_element_type=jnp.float32)       # (heads, TK, TQ)

    m_prev = m_sc[...]                                       # (heads, 1, TQ)
    m_new = jnp.maximum(m_prev, jnp.max(s, axis=1, keepdims=True))
    alpha = jnp.exp(m_prev - m_new)                          # (heads, 1, TQ)
    # bf16 exp path (faster EUP on v6e/v7x); bf16 probs feed the PV matmul.
    p = jnp.exp((s - m_new).astype(jnp.bfloat16))            # (heads, TK, TQ)
    l_sc[...] = alpha * l_sc[...] + jnp.sum(
        p.astype(jnp.float32), axis=1, keepdims=True)        # f32 accumulation
    acc_sc[...] = alpha * acc_sc[...] + jnp.einsum(
        'hdk,hkq->hdq', v, p, preferred_element_type=jnp.float32)
    m_sc[...] = m_new

    @pl.when(ki == pl.num_programs(2) - 1)
    def _():
        h, d, tq = acc_sc.shape
        inv_l = pl.reciprocal(l_sc[...], approx=True)        # (heads, 1, TQ)
        attn = (acc_sc[...] * inv_l).astype(jnp.bfloat16)    # (heads, D, TQ)
        attn_e = attn.reshape(h * d, tq)                     # (E, TQ)
        # conv_out: single (C, E) x (E, TQ) matmul, contraction depth E.
        y = jnp.dot(w_out_ref[...], attn_e,
                    preferred_element_type=jnp.float32)      # (C, TQ)
        y = y + b_out_ref[...]
        o_ref[0] = (x_ref[0].astype(jnp.float32) + y).astype(o_ref.dtype)


# --------------------------------------------------------------------------
# Wrapper
# --------------------------------------------------------------------------
def _pick_seq_tile(L, cap):
    """Largest tile <= cap that divides L and satisfies the (8,128) rule."""
    if L <= cap:
        return L
    t = (cap // 128) * 128
    while t >= 128:
        if L % t == 0:
            return t
        t -= 128
    return L  # fallback: single tile (correct; only used for awkward L)


def attention_forward(x_nchw, w_in, w_out, b_out, *, heads,
                      proj_tile_cap=512, q_tile_cap=512, k_tile_cap=256):
    """x_nchw: (B, C, H, W). w_in: (3E, C). w_out: (C, E). b_out: (C,)."""
    B, C, H, W = x_nchw.shape
    L = H * W
    three_e, c_in = w_in.shape
    assert c_in == C
    E = three_e // 3
    assert 3 * E == three_e and E % heads == 0
    D = E // heads

    x_bcl = x_nchw.reshape(B, C, L)          # free reshape, channels-first

    # NOTE: reference scales by attn.shape[1] ** -0.5 == heads ** -0.5;
    # fold it into the q rows of the conv_in weight.
    scale = float(heads) ** -0.5
    w_in_s = jnp.concatenate([w_in[:E] * scale, w_in[E:]], axis=0)
    w_in_bf = w_in_s.astype(jnp.bfloat16)
    w_out_bf = w_out.astype(jnp.bfloat16)                    # (C, E)
    b_out_2d = b_out.reshape(C, 1).astype(jnp.float32)

    TL = _pick_seq_tile(L, proj_tile_cap)
    TQ = _pick_seq_tile(L, q_tile_cap)
    # v7x megacore: keep at least 2 parallel grid programs when B == 1.
    if B == 1 and TQ == L and L % 256 == 0:
        TQ = L // 2
    TK = _pick_seq_tile(L, k_tile_cap)

    # ---- kernel 1: fused 1x1 conv_in producing packed qkv ----------------
    qkv = pl.pallas_call(
        _qkv_proj_kernel,
        out_shape=jax.ShapeDtypeStruct((B, 3 * E, L), jnp.bfloat16),
        grid=(B, L // TL),
        in_specs=[
            pl.BlockSpec((1, C, TL), lambda b, l: (b, 0, l)),
            pl.BlockSpec((3 * E, C), lambda b, l: (0, 0)),
        ],
        out_specs=pl.BlockSpec((1, 3 * E, TL), lambda b, l: (b, 0, l)),
        compiler_params=pltpu.CompilerParams(
            dimension_semantics=("parallel", "parallel"),
            vmem_limit_bytes=32 * 1024 * 1024),
    )(x_bcl, w_in_bf)

    # Free reshape: split packed 3E axis into (3, heads, D); L stays minor.
    qkv = qkv.reshape(B, 3, heads, D, L)

    # ---- kernel 2: flash attention + conv_out + bias + residual ----------
    n_q, n_k = L // TQ, L // TK
    # TODO(synk): for very large L on v7x, keep K/V VMEM-resident per batch
    # element (memory_space=pl.ANY + manual make_async_copy) instead of
    # re-streaming them from HBM once per q tile.
    out_bcl = pl.pallas_call(
        _flash_attn_kernel,
        out_shape=jax.ShapeDtypeStruct((B, C, L), x_nchw.dtype),
        grid=(B, n_q, n_k),
        in_specs=[
            pl.BlockSpec((1, 1, heads, D, TQ), lambda b, qi, ki: (b, 0, 0, 0, qi)),
            pl.BlockSpec((1, 1, heads, D, TK), lambda b, qi, ki: (b, 1, 0, 0, ki)),
            pl.BlockSpec((1, 1, heads, D, TK), lambda b, qi, ki: (b, 2, 0, 0, ki)),
            pl.BlockSpec((1, C, TQ), lambda b, qi, ki: (b, 0, qi)),
            pl.BlockSpec((C, E), lambda b, qi, ki: (0, 0)),
            pl.BlockSpec((C, 1), lambda b, qi, ki: (0, 0)),
        ],
        out_specs=pl.BlockSpec((1, C, TQ), lambda b, qi, ki: (b, 0, qi)),
        scratch_shapes=[
            pltpu.VMEM((heads, 1, TQ), jnp.float32),   # running max
            pltpu.VMEM((heads, 1, TQ), jnp.float32),   # running sum
            pltpu.VMEM((heads, D, TQ), jnp.float32),   # output accumulator
        ],
        input_output_aliases={3: 0},                   # residual x aliases out
        compiler_params=pltpu.CompilerParams(
            dimension_semantics=("parallel", "parallel", "arbitrary"),
            vmem_limit_bytes=32 * 1024 * 1024),
    )(qkv, qkv, qkv, x_bcl, w_out_bf, b_out_2d)

    return out_bcl.reshape(B, C, H, W)


# --------------------------------------------------------------------------
# Pure-JAX reference (replica of the PyTorch forward) for correctness checks.
# --------------------------------------------------------------------------
def _reference_forward(x_nchw, w_in, w_out, b_out, *, heads):
    B, C, Hs, Ws = x_nchw.shape
    L = Hs * Ws
    E = w_in.shape[0] // 3
    D = E // heads
    x = x_nchw.reshape(B, C, L)                                  # flatten(2)
    h = jnp.einsum('oc,bcl->bol', w_in, x)                       # conv_in
    h = h.reshape(B, 3, heads, D, L)
    q, k, v = h[:, 0], h[:, 1], h[:, 2]                          # (B, H, D, L)
    attn = jnp.einsum('bhki,bhka->bhia', q, k) * heads ** (-0.5)
    attn = jax.nn.softmax(attn, axis=-1)
    o = jnp.einsum('bhia,bhda->bhdi', attn, v)                   # (B, H, D, L)
    o = o.reshape(B, E, L)
    o = jnp.einsum('ce,bel->bcl', w_out, o) + b_out[None, :, None]
    return o.reshape(B, C, Hs, Ws) + x_nchw


if __name__ == "__main__":
    # Small shapes consistent with the module.
    B, C, Hs, Ws = 2, 16, 8, 8
    heads = 4
    E = C                       # embedding_channels defaults to in_channels

    key = jax.random.PRNGKey(0)
    kx, kwi, kwo = jax.random.split(key, 3)

    x = jax.random.normal(kx, (B, C, Hs, Ws), dtype=jnp.float32)

    # conv_in: Conv1d(C, 3E, 1, bias=False)  -> weight (3E, C)
    w_in = jax.random.normal(kwi, (3 * E, C), dtype=jnp.float32) * 0.1
    # conv_out: zero_weights(Conv1d(E, C, 1)) -> weight (C, E) * 1e-6, bias 0
    w_out = jax.random.normal(kwo, (C, E), dtype=jnp.float32) * 1e-6
    b_out = jnp.zeros((C,), dtype=jnp.float32)

    fwd = jax.jit(functools.partial(attention_forward, heads=heads))

    # Check 1: module as initialized (zero-ish conv_out) — tight tolerance.
    out = jax.block_until_ready(fwd(x, w_in, w_out, b_out))
    ref = _reference_forward(x, w_in, w_out, b_out, heads=heads)
    np.testing.assert_allclose(np.asarray(out), np.asarray(ref),
                               rtol=1e-4, atol=1e-5)

    # Check 2: non-degenerate conv_out so the attention path is exercised
    # (bf16 MXU inputs / bf16 exp with f32 accumulation -> looser tolerance).
    w_out2 = jax.random.normal(kwo, (C, E), dtype=jnp.float32) * 0.2
    out2 = jax.block_until_ready(fwd(x, w_in, w_out2, b_out))
    ref2 = _reference_forward(x, w_in, w_out2, b_out, heads=heads)
    np.testing.assert_allclose(np.asarray(out2), np.asarray(ref2),
                               rtol=2e-2, atol=2e-2)

    print("KERNEL_OK")
</pallas_src>

<mosaic_0001>
module attributes {stable_mosaic.version = 11 : i64} {
  func.func @_qkv_proj_kernel(%arg0: i32, %arg1: i32, %arg2: memref<1x16x64xf32, #tpu.memory_space<vmem>>, %arg3: memref<48x16xbf16, #tpu.memory_space<vmem>>, %arg4: memref<1x48x64xbf16, #tpu.memory_space<vmem>>) attributes {dimension_semantics = [#tpu.dimension_semantics<parallel>, #tpu.dimension_semantics<parallel>], iteration_bounds = array<i64: 2, 1>, scalar_prefetch = 0 : i64, scratch_operands = 0 : i64, tpu.core_type = #tpu.core_type<tc>, window_params = [{transform_indices = @transform_0, window_bounds = array<i64: 1, 16, 64>}, {pipeline_mode = #tpu.pipeline_mode<synchronous>, transform_indices = @transform_1, window_bounds = array<i64: 48, 16>}, {transform_indices = @transform_2, window_bounds = array<i64: 1, 48, 64>}]} {
    %c0 = arith.constant 0 : index
    %c0_0 = arith.constant 0 : index
    %c0_1 = arith.constant 0 : index
    %0 = vector.load %arg2[%c0, %c0_0, %c0_1] : memref<1x16x64xf32, #tpu.memory_space<vmem>>, vector<1x16x64xf32>
    %1 = vector.shape_cast %0 : vector<1x16x64xf32> to vector<16x64xf32>
    %2 = arith.truncf %1 : vector<16x64xf32> to vector<16x64xbf16>
    %c0_2 = arith.constant 0 : index
    %c0_3 = arith.constant 0 : index
    %3 = vector.load %arg3[%c0_2, %c0_3] : memref<48x16xbf16, #tpu.memory_space<vmem>>, vector<48x16xbf16>
    %cst = arith.constant dense<0.000000e+00> : vector<48x64xf32>
    %4 = tpu.matmul %3, %2, %cst {dimension_numbers = #tpu.dot_dimension_numbers<[1], [0], [0], [1], [0, 0, 1, 1], [], []>} : vector<48x16xbf16>, vector<16x64xbf16>, vector<48x64xf32> -> vector<48x64xf32>
    %5 = arith.truncf %4 : vector<48x64xf32> to vector<48x64xbf16>
    %c0_4 = arith.constant 0 : index
    %c0_5 = arith.constant 0 : index
    %c0_6 = arith.constant 0 : index
    %6 = vector.load %arg4[%c0_4, %c0_5, %c0_6] : memref<1x48x64xbf16, #tpu.memory_space<vmem>>, vector<1x48x64xbf16>
    %7 = vector.shape_cast %6 : vector<1x48x64xbf16> to vector<48x64xbf16>
    %8 = vector.shape_cast %5 : vector<48x64xbf16> to vector<1x48x64xbf16>
    tpu.vector_store %arg4[%c0_4, %c0_5, %c0_6], %8 {strides = array<i32>} : memref<1x48x64xbf16, #tpu.memory_space<vmem>>, vector<1x48x64xbf16>,
    return
  }
  func.func @transform_0(%arg0: i32, %arg1: i32) -> (i32, i32, i32) {
    %c0_i32 = arith.constant 0 : i32
    %c0_i32_0 = arith.constant 0 : i32
    return %arg0, %c0_i32, %arg1 : i32, i32, i32
  }
  func.func @transform_1(%arg0: i32, %arg1: i32) -> (i32, i32) {
    %c0_i32 = arith.constant 0 : i32
    %c0_i32_0 = arith.constant 0 : i32
    %c0_i32_1 = arith.constant 0 : i32
    return %c0_i32, %c0_i32_0 : i32, i32
  }
  func.func @transform_2(%arg0: i32, %arg1: i32) -> (i32, i32, i32) {
    %c0_i32 = arith.constant 0 : i32
    %c0_i32_0 = arith.constant 0 : i32
    return %arg0, %c0_i32, %arg1 : i32, i32, i32
  }
}

module attributes {stable_mosaic.version = 11 : i64} {
  func.func @_flash_attn_kernel(%arg0: i32, %arg1: i32, %arg2: i32, %arg3: memref<1x1x4x4x64xbf16, #tpu.memory_space<vmem>>, %arg4: memref<1x1x4x4x64xbf16, #tpu.memory_space<vmem>>, %arg5: memref<1x1x4x4x64xbf16, #tpu.memory_space<vmem>>, %arg6: memref<1x16x64xf32, #tpu.memory_space<vmem>>, %arg7: memref<16x16xbf16, #tpu.memory_space<vmem>>, %arg8: memref<16x1xf32, #tpu.memory_space<vmem>>, %arg9: memref<1x16x64xf32, #tpu.memory_space<vmem>>, %arg10: memref<4x1x64xf32, #tpu.memory_space<vmem>>, %arg11: memref<4x1x64xf32, #tpu.memory_space<vmem>>, %arg12: memref<4x4x64xf32, #tpu.memory_space<vmem>>) attributes {dimension_semantics = [#tpu.dimension_semantics<parallel>, #tpu.dimension_semantics<parallel>, #tpu.dimension_semantics<arbitrary>], iteration_bounds = array<i64: 2, 1, 1>, scalar_prefetch = 0 : i64, scratch_operands = 3 : i64, tpu.core_type = #tpu.core_type<tc>, window_params = [{transform_indices = @transform_0, window_bounds = array<i64: 1, 1, 4, 4, 64>}, {transform_indices = @transform_1, window_bounds = array<i64: 1, 1, 4, 4, 64>}, {transform_indices = @transform_2, window_bounds = array<i64: 1, 1, 4, 4, 64>}, {transform_indices = @transform_3, window_bounds = array<i64: 1, 16, 64>}, {pipeline_mode = #tpu.pipeline_mode<synchronous>, transform_indices = @transform_4, window_bounds = array<i64: 16, 16>}, {pipeline_mode = #tpu.pipeline_mode<synchronous>, transform_indices = @transform_5, window_bounds = array<i64: 16, 1>}, {transform_indices = @transform_6, window_bounds = array<i64: 1, 16, 64>}]} {
    %c0_i32 = arith.constant 0 : i32
    %0 = arith.cmpi eq, %arg2, %c0_i32 : i32
    %1 = arith.extui %0 : i1 to i32
    %c0_i32_0 = arith.constant 0 : i32
    %2 = arith.cmpi ne, %1, %c0_i32_0 : i32
    scf.if %2 {
      %cst_38 = arith.constant 0xFF800000 : f32
      %37 = vector.broadcast %cst_38 : f32 to vector<4x1x64xf32>
      %c0_39 = arith.constant 0 : index
      %c0_40 = arith.constant 0 : index
      %c0_41 = arith.constant 0 : index
      %38 = vector.load %arg10[%c0_39, %c0_40, %c0_41] : memref<4x1x64xf32, #tpu.memory_space<vmem>>, vector<4x1x64xf32>
      tpu.vector_store %arg10[%c0_39, %c0_40, %c0_41], %37 {strides = array<i32>} : memref<4x1x64xf32, #tpu.memory_space<vmem>>, vector<4x1x64xf32>,
      %cst_42 = arith.constant 0.000000e+00 : f32
      %39 = vector.broadcast %cst_42 : f32 to vector<4x1x64xf32>
      %c0_43 = arith.constant 0 : index
      %c0_44 = arith.constant 0 : index
      %c0_45 = arith.constant 0 : index
      %40 = vector.load %arg11[%c0_43, %c0_44, %c0_45] : memref<4x1x64xf32, #tpu.memory_space<vmem>>, vector<4x1x64xf32>
      tpu.vector_store %arg11[%c0_43, %c0_44, %c0_45], %39 {strides = array<i32>} : memref<4x1x64xf32, #tpu.memory_space<vmem>>, vector<4x1x64xf32>,
      %cst_46 = arith.constant 0.000000e+00 : f32
      %41 = vector.broadcast %cst_46 : f32 to vector<4x4x64xf32>
      %c0_47 = arith.constant 0 : index
      %c0_48 = arith.constant 0 : index
      %c0_49 = arith.constant 0 : index
      %42 = vector.load %arg12[%c0_47, %c0_48, %c0_49] : memref<4x4x64xf32, #tpu.memory_space<vmem>>, vector<4x4x64xf32>
      tpu.vector_store %arg12[%c0_47, %c0_48, %c0_49], %41 {strides = array<i32>} : memref<4x4x64xf32, #tpu.memory_space<vmem>>, vector<4x4x64xf32>,
    } else {
    }
    %c0 = arith.constant 0 : index
    %c0_1 = arith.constant 0 : index
    %c0_2 = arith.constant 0 : index
    %c0_3 = arith.constant 0 : index
    %c0_4 = arith.constant 0 : index
    %3 = vector.load %arg3[%c0, %c0_1, %c0_2, %c0_3, %c0_4] : memref<1x1x4x4x64xbf16, #tpu.memory_space<vmem>>, vector<1x1x4x4x64xbf16>
    %4 = vector.shape_cast %3 : vector<1x1x4x4x64xbf16> to vector<4x4x64xbf16>
    %c0_5 = arith.constant 0 : index
    %c0_6 = arith.constant 0 : index
    %c0_7 = arith.constant 0 : index
    %c0_8 = arith.constant 0 : index
    %c0_9 = arith.constant 0 : index
    %5 = vector.load %arg4[%c0_5, %c0_6, %c0_7, %c0_8, %c0_9] : memref<1x1x4x4x64xbf16, #tpu.memory_space<vmem>>, vector<1x1x4x4x64xbf16>
    %6 = vector.shape_cast %5 : vector<1x1x4x4x64xbf16> to vector<4x4x64xbf16>
    %c0_10 = arith.constant 0 : index
    %c0_11 = arith.constant 0 : index
    %c0_12 = arith.constant 0 : index
    %c0_13 = arith.constant 0 : index
    %c0_14 = arith.constant 0 : index
    %7 = vector.load %arg5[%c0_10, %c0_11, %c0_12, %c0_13, %c0_14] : memref<1x1x4x4x64xbf16, #tpu.memory_space<vmem>>, vector<1x1x4x4x64xbf16>
    %8 = vector.shape_cast %7 : vector<1x1x4x4x64xbf16> to vector<4x4x64xbf16>
    "tpu.trace_start"() <{level = 10 : i32, message = "hdk,hdq->hkq"}> : () -> ()
    %cst = arith.constant dense<0.000000e+00> : vector<4x64x64xf32>
    %9 = tpu.matmul %6, %4, %cst {dimension_numbers = #tpu.dot_dimension_numbers<[1], [1], [2], [2], [0, 0, 0, 2, 1, 2], [0], [0]>} : vector<4x4x64xbf16>, vector<4x4x64xbf16>, vector<4x64x64xf32> -> vector<4x64x64xf32>
    "tpu.trace_stop"() : () -> ()
    %c0_15 = arith.constant 0 : index
    %c0_16 = arith.constant 0 : index
    %c0_17 = arith.constant 0 : index
    %10 = vector.load %arg10[%c0_15, %c0_16, %c0_17] : memref<4x1x64xf32, #tpu.memory_space<vmem>>, vector<4x1x64xf32>
    %cst_18 = arith.constant dense<0xFF800000> : vector<4x64xf32>
    %11 = vector.multi_reduction <maximumf>, %9, %cst_18 [1] : vector<4x64x64xf32> to vector<4x64xf32>
    %12 = vector.shape_cast %11 : vector<4x64xf32> to vector<4x1x64xf32>
    %13 = arith.maximumf %10, %12 : vector<4x1x64xf32>
    %14 = arith.subf %10, %13 : vector<4x1x64xf32>
    %15 = math.exp %14 : vector<4x1x64xf32>
    %16 = vector.broadcast %13 : vector<4x1x64xf32> to vector<4x64x64xf32>
    %17 = arith.subf %9, %16 : vector<4x64x64xf32>
    %18 = arith.truncf %17 : vector<4x64x64xf32> to vector<4x64x64xbf16>
    %19 = math.exp %18 : vector<4x64x64xbf16>
    %c0_19 = arith.constant 0 : index
    %c0_20 = arith.constant 0 : index
    %c0_21 = arith.constant 0 : index
    %20 = vector.load %arg11[%c0_19, %c0_20, %c0_21] : memref<4x1x64xf32, #tpu.memory_space<vmem>>, vector<4x1x64xf32>
    %21 = arith.mulf %15, %20 : vector<4x1x64xf32>
    %22 = arith.extf %19 : vector<4x64x64xbf16> to vector<4x64x64xf32>
    %cst_22 = arith.constant dense<0.000000e+00> : vector<4x64xf32>
    %23 = vector.multi_reduction <add>, %22, %cst_22 [1] : vector<4x64x64xf32> to vector<4x64xf32>
    %24 = vector.shape_cast %23 : vector<4x64xf32> to vector<4x1x64xf32>
    %25 = arith.addf %21, %24 : vector<4x1x64xf32>
    %c0_23 = arith.constant 0 : index
    %c0_24 = arith.constant 0 : index
    %c0_25 = arith.constant 0 : index
    %26 = vector.load %arg11[%c0_23, %c0_24, %c0_25] : memref<4x1x64xf32, #tpu.memory_space<vmem>>, vector<4x1x64xf32>
    tpu.vector_store %arg11[%c0_23, %c0_24, %c0_25], %25 {strides = array<i32>} : memref<4x1x64xf32, #tpu.memory_space<vmem>>, vector<4x1x64xf32>,
    %c0_26 = arith.constant 0 : index
    %c0_27 = arith.constant 0 : index
    %c0_28 = arith.constant 0 : index
    %27 = vector.load %arg12[%c0_26, %c0_27, %c0_28] : memref<4x4x64xf32, #tpu.memory_space<vmem>>, vector<4x4x64xf32>
    %28 = vector.broadcast %15 : vector<4x1x64xf32> to vector<4x4x64xf32>
    %29 = arith.mulf %28, %27 : vector<4x4x64xf32>
    "tpu.trace_start"() <{level = 10 : i32, message = "hdk,hkq->hdq"}> : () -> ()
    %cst_29 = arith.constant dense<0.000000e+00> : vector<4x4x64xf32>
    %30 = tpu.matmul %8, %19, %cst_29 {dimension_numbers = #tpu.dot_dimension_numbers<[2], [1], [1], [2], [0, 0, 0, 1, 1, 2], [0], [0]>} : vector<4x4x64xbf16>, vector<4x64x64xbf16>, vector<4x4x64xf32> -> vector<4x4x64xf32>
    "tpu.trace_stop"() : () -> ()
    %31 = arith.addf %29, %30 : vector<4x4x64xf32>
    %c0_30 = arith.constant 0 : index
    %c0_31 = arith.constant 0 : index
    %c0_32 = arith.constant 0 : index
    %32 = vector.load %arg12[%c0_30, %c0_31, %c0_32] : memref<4x4x64xf32, #tpu.memory_space<vmem>>, vector<4x4x64xf32>
    tpu.vector_store %arg12[%c0_30, %c0_31, %c0_32], %31 {strides = array<i32>} : memref<4x4x64xf32, #tpu.memory_space<vmem>>, vector<4x4x64xf32>,
    %c0_33 = arith.constant 0 : index
    %c0_34 = arith.constant 0 : index
    %c0_35 = arith.constant 0 : index
    %33 = vector.load %arg10[%c0_33, %c0_34, %c0_35] : memref<4x1x64xf32, #tpu.memory_space<vmem>>, vector<4x1x64xf32>
    tpu.vector_store %arg10[%c0_33, %c0_34, %c0_35], %13 {strides = array<i32>} : memref<4x1x64xf32, #tpu.memory_space<vmem>>, vector<4x1x64xf32>,
    %c0_i32_36 = arith.constant 0 : i32
    %34 = arith.cmpi eq, %arg2, %c0_i32_36 : i32
    %35 = arith.extui %34 : i1 to i32
    %c0_i32_37 = arith.constant 0 : i32
    %36 = arith.cmpi ne, %35, %c0_i32_37 : i32
    scf.if %36 {
      %c0_38 = arith.constant 0 : index
      %c0_39 = arith.constant 0 : index
      %c0_40 = arith.constant 0 : index
      %37 = vector.load %arg11[%c0_38, %c0_39, %c0_40] : memref<4x1x64xf32, #tpu.memory_space<vmem>>, vector<4x1x64xf32>
      %38 = tpu.reciprocal %37 {approx = true} : vector<4x1x64xf32> -> vector<4x1x64xf32>
      %c0_41 = arith.constant 0 : index
      %c0_42 = arith.constant 0 : index
      %c0_43 = arith.constant 0 : index
      %39 = vector.load %arg12[%c0_41, %c0_42, %c0_43] : memref<4x4x64xf32, #tpu.memory_space<vmem>>, vector<4x4x64xf32>
      %40 = vector.broadcast %38 : vector<4x1x64xf32> to vector<4x4x64xf32>
      %41 = arith.mulf %39, %40 : vector<4x4x64xf32>
      %42 = arith.truncf %41 : vector<4x4x64xf32> to vector<4x4x64xbf16>
      %43 = vector.shape_cast %42 : vector<4x4x64xbf16> to vector<16x64xbf16>
      %c0_44 = arith.constant 0 : index
      %c0_45 = arith.constant 0 : index
      %44 = vector.load %arg7[%c0_44, %c0_45] : memref<16x16xbf16, #tpu.memory_space<vmem>>, vector<16x16xbf16>
      %cst_46 = arith.constant dense<0.000000e+00> : vector<16x64xf32>
      %45 = tpu.matmul %44, %43, %cst_46 {dimension_numbers = #tpu.dot_dimension_numbers<[1], [0], [0], [1], [0, 0, 1, 1], [], []>} : vector<16x16xbf16>, vector<16x64xbf16>, vector<16x64xf32> -> vector<16x64xf32>
      %c0_47 = arith.constant 0 : index
      %c0_48 = arith.constant 0 : index
      %46 = vector.load %arg8[%c0_47, %c0_48] : memref<16x1xf32, #tpu.memory_space<vmem>>, vector<16x1xf32>
      %47 = vector.broadcast %46 : vector<16x1xf32> to vector<16x64xf32>
      %48 = arith.addf %45, %47 : vector<16x64xf32>
      %c0_49 = arith.constant 0 : index
      %c0_50 = arith.constant 0 : index
      %c0_51 = arith.constant 0 : index
      %49 = vector.load %arg6[%c0_49, %c0_50, %c0_51] : memref<1x16x64xf32, #tpu.memory_space<vmem>>, vector<1x16x64xf32>
      %50 = vector.shape_cast %49 : vector<1x16x64xf32> to vector<16x64xf32>
      %51 = arith.addf %50, %48 : vector<16x64xf32>
      %c0_52 = arith.constant 0 : index
      %c0_53 = arith.constant 0 : index
      %c0_54 = arith.constant 0 : index
      %52 = vector.load %arg9[%c0_52, %c0_53, %c0_54] : memref<1x16x64xf32, #tpu.memory_space<vmem>>, vector<1x16x64xf32>
      %53 = vector.shape_cast %52 : vector<1x16x64xf32> to vector<16x64xf32>
      %54 = vector.shape_cast %51 : vector<16x64xf32> to vector<1x16x64xf32>
      tpu.vector_store %arg9[%c0_52, %c0_53, %c0_54], %54 {strides = array<i32>} : memref<1x16x64xf32, #tpu.memory_space<vmem>>, vector<1x16x64xf32>,
    } else {
    }
    return
  }
  func.func @transform_0(%arg0: i32, %arg1: i32, %arg2: i32) -> (i32, i32, i32, i32, i32) {
    %c0_i32 = arith.constant 0 : i32
    %c0_i32_0 = arith.constant 0 : i32
    %c0_i32_1 = arith.constant 0 : i32
    %c0_i32_2 = arith.constant 0 : i32
    return %arg0, %c0_i32, %c0_i32_0, %c0_i32_1, %arg1 : i32, i32, i32, i32, i32
  }
  func.func @transform_1(%arg0: i32, %arg1: i32, %arg2: i32) -> (i32, i32, i32, i32, i32) {
    %c1_i32 = arith.constant 1 : i32
    %c0_i32 = arith.constant 0 : i32
    %c0_i32_0 = arith.constant 0 : i32
    %c0_i32_1 = arith.constant 0 : i32
    return %arg0, %c1_i32, %c0_i32, %c0_i32_0, %arg2 : i32, i32, i32, i32, i32
  }
  func.func @transform_2(%arg0: i32, %arg1: i32, %arg2: i32) -> (i32, i32, i32, i32, i32) {
    %c2_i32 = arith.constant 2 : i32
    %c0_i32 = arith.constant 0 : i32
    %c0_i32_0 = arith.constant 0 : i32
    %c0_i32_1 = arith.constant 0 : i32
    return %arg0, %c2_i32, %c0_i32, %c0_i32_0, %arg2 : i32, i32, i32, i32, i32
  }
  func.func @transform_3(%arg0: i32, %arg1: i32, %arg2: i32) -> (i32, i32, i32) {
    %c0_i32 = arith.constant 0 : i32
    %c0_i32_0 = arith.constant 0 : i32
    return %arg0, %c0_i32, %arg1 : i32, i32, i32
  }
  func.func @transform_4(%arg0: i32, %arg1: i32, %arg2: i32) -> (i32, i32) {
    %c0_i32 = arith.constant 0 : i32
    %c0_i32_0 = arith.constant 0 : i32
    %c0_i32_1 = arith.constant 0 : i32
    return %c0_i32, %c0_i32_0 : i32, i32
  }
  func.func @transform_5(%arg0: i32, %arg1: i32, %arg2: i32) -> (i32, i32) {
    %c0_i32 = arith.constant 0 : i32
    %c0_i32_0 = arith.constant 0 : i32
    %c0_i32_1 = arith.constant 0 : i32
    return %c0_i32, %c0_i32_0 : i32, i32
  }
  func.func @transform_6(%arg0: i32, %arg1: i32, %arg2: i32) -> (i32, i32, i32) {
    %c0_i32 = arith.constant 0 : i32
    %c0_i32_0 = arith.constant 0 : i32
    return %arg0, %c0_i32, %arg1 : i32, i32, i32
  }
}

</mosaic_0001>

<bundles_post_ra>
// kernel: attention_forward.2
= control target key start
LH: loop header
LB: loop body
LE: loop exit
PB: predicated region body
PF: predicated region fallthrough
CT: control target
= control target key end

     0   :  { %s425_s9 = smov 0   ;;  %s427_s10 = smov 0   ;;  %s473_s0 = inlined_call_operand.vmem [shape: f32[2,16,64], index: 0, kind: input, shape index: {}]   ;;  %s474_s1 = inlined_call_operand.vmem [shape: bf16[48,16], index: 1, kind: input, shape index: {}]   ;;  %s475_s2 = inlined_call_operand.vmem [shape: bf16[2,48,64], index: 2, kind: output, shape index: {}]  }
   0x1   :  { %s429_s11 = smov 0  }
   0x2 LB: > { %s24_s12 = sadd.s32 1, %s404_s10  ;;  %p334_p0 = scmp.ge.s32.totalorder %s408_s11, 1  ;;  %s408_s11 = sphi %s429_s11, %s12_s11   ;;  %s404_s10 = sphi %s427_s10, %s477_s10   ;;  %s400_s9 = sphi %s425_s9, %s476_s9  }
   0x3   : > { %p26_p1 = scmp.ge.s32.totalorder %s24_s12, 2  ;;  %p131_p2 = scmp.lt.s32.totalorder %s408_s11, 3 }
   0x5   : > { %s479_s12 = smov (%p26_p1, %s24_s12), 0  ;;  %p132_p3 = pnand %p334_p0, %p131_p2 }
   0x6   : > { %p159_p4 = scmp.lt.s32.totalorder (!%p132_p3), %s400_s9, 1 }
   0x7   : > { %135 = sbr.rel (%p132_p3) target bundleno = 165 (0xa5), region = 28 }
   0xc   : > { %s481_s9 = smov (!%p159_p4, %s400_s9), 1  ;;  %v356_v3 = vld [vmem:[%s474_s1] sm:$0xff]  ;;  %v357_v4 = vld [vmem:[%s474_s1 + $0x8] sm:$0xff]  ;;  %vm200_vm0 = vcmask 130048   ;;  %v358_v5 = vld [vmem:[%s474_s1 + $0x10] sm:$0xff]  ;;  %vm240_vm1 = vcmask 519168  }
   0xd   : > { %s355_s13 = sshll.u32 %s481_s9, 4  ;;  %s361_s23 = smul.u32 24, %s481_s9 }
   0xe   : > { %s166_s16 = scalar_lea.vmem %s473_s0, %s355_s13 }
   0xf   : > { %v176_v0 = vld [vmem:[%s166_s16] sm:$0xff]  ;;  %v177_v1 = vld [vmem:[%s166_s16 + $0x8] sm:$0xff]  ;;  %s174_s26 = scalar_lea.vmem %s475_s2, %s361_s23 }
  0x10   : > { %v178_v2 = vpack.c.bf16 %v177_v1, %v176_v0 }
  0x12   : > { %217 = vmatpush.bf16.msra.mxu0 %v178_v2  ;;  %359 = vmatpush.bf16.msra.mxu1 %v178_v2 }
  0x13   : > { %360 = vmatpush.bf16.msra.mxu2 %v178_v2 }
  0x15   : > { %350 = vmatmul.msk.bf16.vlgmr.msra.gmra.mxu0 %vm200_vm0, %v356_v3  ;;  %351 = vmatmul.msk.bf16.vlgmr.msra.gmra.mxu1 %vm200_vm0, %v357_v4 }
  0x16   : > { %352 = vmatmul.msk.bf16.vlgmr.msra.gmra.mxu2 %vm200_vm0, %v358_v5 }
  0x92   : > { %v219_v6 = vpop.f32.mrf.mxu0  ;;  %v224_v7 = vpop.f32.mrf.mxu1 }
  0x93   : > { %v234_v8 = vpack.c.bf16 %v219_v6, %v219_v6  ;;  %v236_v9 = vpack.c.bf16 %v224_v7, %v224_v7 }
  0x95   : > { %241 = vst.msk [vmem:[%s174_s26] sm:$0xf] %vm240_vm1, %v234_v8 }
  0x96   : > { %243 = vst.msk [vmem:[%s174_s26 + $0x8] sm:$0xf] %vm240_vm1, %v236_v9 }
  0x99   : > { %v229_v10 = vpop.f32.mrf.mxu2 }
  0x9a   : > { %v238_v11 = vpack.c.bf16 %v229_v10, %v229_v10  ;;  %v221_v12 = vpop.f32.mrf.mxu0  ;;  %v226_v13 = vpop.f32.mrf.mxu1 }
  0x9b   : > { %v235_v14 = vpack.c.bf16 %v221_v12, %v221_v12  ;;  %v237_v15 = vpack.c.bf16 %v226_v13, %v226_v13 }
  0x9c   : > { %245 = vst.msk [vmem:[%s174_s26 + $0x10] sm:$0xf] %vm240_vm1, %v238_v11 }
  0x9d   : > { %242 = vst.msk [vmem:[%s174_s26 + $0x4] sm:$0xf] %vm240_vm1, %v235_v14 }
  0x9e   : > { %244 = vst.msk [vmem:[%s174_s26 + $0xc] sm:$0xf] %vm240_vm1, %v237_v15 }
  0xa1   : > { %v231_v16 = vpop.f32.mrf.mxu2 }
  0xa2   : > { %v239_v17 = vpack.c.bf16 %v231_v16, %v231_v16 }
  0xa4   : > { %246 = vst.msk [vmem:[%s174_s26 + $0x14] sm:$0xf] %vm240_vm1, %v239_v17 }
  0xa5 PF: > { %s12_s11 = sadd.s32 1, %s408_s11   ;;  %s476_s9 = smov %s404_s10 }
  0xa6   : > { %p9_p5 = scmp.ge.s32.totalorder %s12_s11, 4   ;;  %s477_s10 = smov %s479_s12 }
  0xa8   :  { %11 = sbr.rel (!%p9_p5) target bundleno = 2 (0x2), region = 58 }

// kernel: attention_forward.3
= control target key start
LH: loop header
LB: loop body
LE: loop exit
PB: predicated region body
PF: predicated region fallthrough
CT: control target
= control target key end

     0   :  { %s1774_s21 = smov 0   ;;  %s1776_s22 = smov 0   ;;  %s2234_s0 = inlined_call_operand.vmem [shape: bf16[2,3,4,4,64], index: 0, kind: input, shape index: {}, may-alias: {0,1,2}]   ;;  %s2235_s1 = inlined_call_operand.vmem [shape: bf16[2,3,4,4,64], index: 1, kind: input, shape index: {}, may-alias: {0,1,2}]   ;;  %s2236_s2 = inlined_call_operand.vmem [shape: bf16[2,3,4,4,64], index: 2, kind: input, shape index: {}, may-alias: {0,1,2}]   ;;  %s2237_s3 = inlined_call_operand.vmem [shape: f32[2,16,64], index: 3, kind: input, shape index: {}, may-alias: {3,6}]   ;;  %s2238_s4 = inlined_call_operand.vmem [shape: bf16[16,16], index: 4, kind: input, shape index: {}]   ;;  %s2239_s5 = inlined_call_operand.vmem [shape: f32[16,1], index: 5, kind: input, shape index: {}]   ;;  %s2240_s6 = inlined_call_operand.vmem [shape: f32[2,16,64], index: 6, kind: output, shape index: {}, may-alias: {3,6}]  }
   0x1   :  { %s1778_s23 = smov 0  }
   0x2 LB: > { %s35_s24 = sadd.s32 1, %s1730_s22  ;;  %p1538_p0 = scmp.ge.s32.totalorder %s1734_s23, 1  ;;  %s1734_s23 = sphi %s1778_s23, %s16_s23   ;;  %s1730_s22 = sphi %s1776_s22, %s2242_s22   ;;  %s1726_s21 = sphi %s1774_s21, %s2241_s21  }
   0x3   : > { %p37_p1 = scmp.ge.s32.totalorder %s35_s24, 2  ;;  %p285_p2 = scmp.lt.s32.totalorder %s1734_s23, 3 }
   0x5   : > { %s2244_s24 = smov (%p37_p1, %s35_s24), 0  ;;  %p286_p3 = pnand %p1538_p0, %p285_p2 }
   0x6   : > { %p347_p4 = scmp.lt.s32.totalorder (!%p286_p3), %s1726_s21, 1 }
   0x7   : > { %289 = sbr.rel (%p286_p3) target bundleno = 796 (0x31c), region = 44 }
   0xc   : > { %s2246_s21 = smov (!%p347_p4, %s1726_s21), 1  ;;  %vm449_vm0 = vcmask 1041408   ;;  %vm436_vm1 = vcmask 31744   ;;  %vm394_vm2 = vcmask 516096   ;;  %v1736_v33 = vmov -inf  }
   0xd   : > { %s1795_s25 = smul.u32 24, %s2246_s21  ;;  %397 = vst.msk [vmem:[#allocation2 + $0x2] sm:$0x1] %vm394_vm2, %v1736_v33  ;;  %vm666_vm3 = vcmask 523264   ;;  %vm403_vm4 = vcmask 519168   ;;  %vm1364_vm5 = vcmask 130048  }
   0xe   : > { %395 = vst.msk [vmem:[#allocation2] sm:$0x1] %vm394_vm2, %v1736_v33  ;;  %s1581_s17 = sshll.u32 %s2246_s21, 4 }
   0xf   : > { %s1462_s28 = scalar_lea.vmem %s2235_s1, %s1795_s25  ;;  %s354_s7 = scalar_lea.vmem %s2234_s0, %s1795_s25  ;;  %396 = vst.msk [vmem:[#allocation2 + $0x1] sm:$0x1] %vm394_vm2, %v1736_v33 }
  0x10   : > { %v1548_v0 = vld [vmem:[%s1462_s28 + $0xc] sm:$0x3]  ;;  %v1549_v1 = vld [vmem:[%s1462_s28 + $0xe] sm:$0x3]  ;;  %v410_v2 = vld [vmem:[%s354_s7 + $0x4] sm:$0x3]  ;;  %s2011_s10 = scalar_lea.vmem %s2236_s2, %s1795_s25  ;;  %s380_s20 = scalar_lea.vmem %s2237_s3, %s1581_s17 }
  0x11   : > { %1612 = vxpose.binary.xlu0.c.b16.start.end [1/2] (short) (narrow) %v1549_v1, %v1548_v0, 64  ;;  %v571_v3 = vsel %vm449_vm0, %v410_v2, 0  ;;  %v1546_v4 = vld [vmem:[%s1462_s28 + $0x8] sm:$0x3]  ;;  %v1547_v5 = vld [vmem:[%s1462_s28 + $0xa] sm:$0x3]  ;;  %s388_s27 = scalar_lea.vmem %s2240_s6, %s1581_s17 }
  0x12   : > { %580 = vmatpush.bf16.msra.mxu2 %v571_v3  ;;  %v411_v6 = vld [vmem:[%s354_s7 + $0x6] sm:$0x3]  ;;  %v408_v12 = vld [vmem:[%s354_s7] sm:$0x3]  ;;  %v409_v15 = vld [vmem:[%s354_s7 + $0x2] sm:$0x3] }
  0x13   : > { %v631_v7 = vsel %vm449_vm0, %v411_v6, 0  ;;  %v451_v13 = vsel %vm449_vm0, %v408_v12, 0  ;;  %v511_v16 = vsel %vm449_vm0, %v409_v15, 0  ;;  %398 = vst.msk [vmem:[#allocation2 + $0x3] sm:$0x1] %vm394_vm2, %v1736_v33 }
  0x14   : > { %640 = vmatpush.bf16.msra.mxu3 %v631_v7  ;;  %460 = vmatpush.bf16.msra.mxu0 %v451_v13 }
  0x15   : > { %520 = vmatpush.bf16.msra.mxu1 %v511_v16 }
  0x51   : > { %1621 = vxpose.binary.xlu0.c.b16.start.end [1/2] (short) (narrow) %v1547_v5, %v1546_v4, 64 }
  0xbd   : > { %v1613_v8 = vpop.trf.xlu0 }
  0xbe   : > { %1562 = vmatmul.msk.bf16.vlgmr.msra.gmra.mxu2 %vm436_vm1, %v1613_v8 }
  0xc5   : > { %v1614_v9 = vpop.trf.xlu0 }
  0xc6   : > { %1566 = vmatmul.msk.bf16.vlgmr.msra.gmra.mxu3 %vm436_vm1, %v1614_v9 }
  0xcd   : > { %v1615_v10 = vpop.trf.xlu0 }
  0xce   : > { %1563 = vmatmul.msk.bf16.gmra.mxu2 %vm436_vm1, %v1615_v10 }
  0xd5   : > { %v1616_v11 = vpop.trf.xlu0 }
  0xd6   : > { %1567 = vmatmul.msk.bf16.gmra.mxu3 %vm436_vm1, %v1616_v11 }
  0xdd   : > { %v1617_v14 = vpop.trf.xlu0 }
  0xde   : > { %1564 = vmatmul.msk.bf16.gmra.mxu2 %vm436_vm1, %v1617_v14 }
  0xe5   : > { %v1618_v17 = vpop.trf.xlu0 }
  0xe6   : > { %1568 = vmatmul.msk.bf16.gmra.mxu3 %vm436_vm1, %v1618_v17 }
  0xed   : > { %v1619_v18 = vpop.trf.xlu0 }
  0xee   : > { %1565 = vmatmul.msk.bf16.gmra.mxu2 %vm436_vm1, %v1619_v18 }
  0xf5   : > { %v1620_v19 = vpop.trf.xlu0 }
  0xf6   : > { %1569 = vmatmul.msk.bf16.gmra.mxu3 %vm436_vm1, %v1620_v19 }
  0xfd   : > { %v1622_v20 = vpop.trf.xlu0 }
  0xfe   : > { %1554 = vmatmul.msk.bf16.vlgmr.msra.gmra.mxu0 %vm436_vm1, %v1622_v20  ;;  %v1890_v20 = vld [vmem:[#allocation2 + $0x2] sm:$0x1] }
 0x105   : > { %v1623_v21 = vpop.trf.xlu0 }
 0x106   : > { %1558 = vmatmul.msk.bf16.vlgmr.msra.gmra.mxu1 %vm436_vm1, %v1623_v21 }
 0x10d   : > { %v1624_v22 = vpop.trf.xlu0 }
 0x10e   : > { %1555 = vmatmul.msk.bf16.gmra.mxu0 %vm436_vm1, %v1624_v22 }
 0x115   : > { %v1625_v23 = vpop.trf.xlu0 }
 0x116   : > { %1559 = vmatmul.msk.bf16.gmra.mxu1 %vm436_vm1, %v1625_v23 }
 0x11d   : > { %v1626_v24 = vpop.trf.xlu0 }
 0x11e   : > { %1556 = vmatmul.msk.bf16.gmra.mxu0 %vm436_vm1, %v1626_v24 }
 0x125   : > { %v1627_v25 = vpop.trf.xlu0 }
 0x126   : > { %1560 = vmatmul.msk.bf16.gmra.mxu1 %vm436_vm1, %v1627_v25 }
 0x12d   : > { %v1628_v26 = vpop.trf.xlu0 }
 0x12e   : > { %1557 = vmatmul.msk.bf16.gmra.mxu0 %vm436_vm1, %v1628_v26 }
 0x135   : > { %v1629_v27 = vpop.trf.xlu0 }
 0x136   : > { %1561 = vmatmul.msk.bf16.gmra.mxu1 %vm436_vm1, %v1629_v27 }
 0x141   : > { %v1825_v28 = vpop.f32.mrf.mxu2 }
 0x142   : > { %v709_v41 = vsel %vm666_vm3, %v1825_v28, -inf }
 0x149   : > { %v1827_v29 = vpop.f32.mrf.mxu2  ;;  %v1829_v30 = vpop.f32.mrf.mxu3 }
 0x14a   : > { %v710_v40 = vsel %vm666_vm3, %v1827_v29, -inf  ;;  %v730_v53 = vsel %vm666_vm3, %v1829_v30, -inf }
 0x14b   : > { %v711_v43 = vmax.f32 %v709_v41, %v710_v40  ;;  %v1737_v40 = vmov 0.0  }
 0x14c   : > { %401 = vst.msk [vmem:[#allocation3 + $0x2] sm:$0x1] %vm394_vm2, %v1737_v40 }
 0x14d   : > { %406 = vst.msk [vmem:[#allocation4 + $0x8] sm:$0xf] %vm403_vm4, %v1737_v40 }
 0x14e   : > { %399 = vst.msk [vmem:[#allocation3] sm:$0x1] %vm394_vm2, %v1737_v40 }
 0x14f   : > { %400 = vst.msk [vmem:[#allocation3 + $0x1] sm:$0x1] %vm394_vm2, %v1737_v40 }
 0x150   : > { %402 = vst.msk [vmem:[#allocation3 + $0x3] sm:$0x1] %vm394_vm2, %v1737_v40 }
 0x151   : > { %v1831_v31 = vpop.f32.mrf.mxu2  ;;  %v1833_v32 = vpop.f32.mrf.mxu3  ;;  %404 = vst.msk [vmem:[#allocation4] sm:$0xf] %vm403_vm4, %v1737_v40 }
 0x152   : > { %v712_v42 = vsel %vm666_vm3, %v1831_v31, -inf  ;;  %v731_v50 = vsel %vm666_vm3, %v1833_v32, -inf  ;;  %405 = vst.msk [vmem:[#allocation4 + $0x4] sm:$0xf] %vm403_vm4, %v1737_v40 }
 0x153   : > { %v713_v45 = vmax.f32 %v711_v43, %v712_v42  ;;  %v732_v56 = vmax.f32 %v730_v53, %v731_v50  ;;  %v1904_v43 = vld [vmem:[#allocation2 + $0x3] sm:$0x1]  ;;  %407 = vst.msk [vmem:[#allocation4 + $0xc] sm:$0xf] %vm403_vm4, %v1737_v40 }
 0x159   : > { %v1839_v34 = vpop.f32.mrf.mxu2  ;;  %v1841_v35 = vpop.f32.mrf.mxu3 }
 0x15a   : > { %v714_v44 = vsel %vm666_vm3, %v1839_v34, -inf  ;;  %v733_v54 = vsel %vm666_vm3, %v1841_v35, -inf }
 0x15b   : > { %v715_v49 = vmax.f32 %v713_v45, %v714_v44  ;;  %v734_v59 = vmax.f32 %v732_v56, %v733_v54 }
 0x161   : > { %v1843_v36 = vpop.f32.mrf.mxu2  ;;  %v1845_v37 = vpop.f32.mrf.mxu3 }
 0x162   : > { %v716_v48 = vsel %vm666_vm3, %v1843_v36, -inf  ;;  %v735_v58 = vsel %vm666_vm3, %v1845_v37, -inf }
 0x163   : > { %v717_v52 = vmax.f32 %v715_v49, %v716_v48  ;;  %v736_v1 = vmax.f32 %v734_v59, %v735_v58 }
 0x169   : > { %v1847_v38 = vpop.f32.mrf.mxu2  ;;  %v1849_v39 = vpop.f32.mrf.mxu3 }
 0x16a   : > { %v718_v51 = vsel %vm666_vm3, %v1847_v38, -inf  ;;  %v737_v63 = vsel %vm666_vm3, %v1849_v39, -inf }
 0x16b   : > { %v719_v57 = vmax.f32 %v717_v52, %v718_v51  ;;  %v738_v5 = vmax.f32 %v736_v1, %v737_v63 }
 0x171   : > { %v597_v46 = vpop.f32.mrf.mxu2  ;;  %v1859_v47 = vpop.f32.mrf.mxu3 }
 0x172   : > { %v720_v55 = vsel %vm666_vm3, %v597_v46, -inf  ;;  %v739_v4 = vsel %vm666_vm3, %v1859_v47, -inf }
 0x173   : > { %v721_v60 = vmax.f32 %v719_v57, %v720_v55  ;;  %v740_v8 = vmax.f32 %v738_v5, %v739_v4 }
 0x179   : > { %v599_v61 = vpop.f32.mrf.mxu2  ;;  %v1874_v62 = vpop.f32.mrf.mxu3 }
 0x17a   : > { %v722_v0 = vsel %vm666_vm3, %v599_v61, -inf  ;;  %v741_v7 = vsel %vm666_vm3, %v1874_v62, -inf }
 0x17b   : > { %v723_v2 = vmax.f32 %v721_v60, %v722_v0  ;;  %v1879_v3 = vpop.f32.mrf.mxu0  ;;  %v742_v11 = vmax.f32 %v740_v8, %v741_v7 }
 0x17d   : > { %v724_v6 = vrot.slane %v723_v2, 4 }
 0x17f   : > { %v725_v9 = vmax.f32 %v723_v2, %v724_v6 }
 0x181   : > { %v726_v10 = vrot.slane %v725_v9, 2  ;;  %v659_v12 = vpop.f32.mrf.mxu3 }
 0x182   : > { %v743_v13 = vsel %vm666_vm3, %v659_v12, -inf }
 0x183   : > { %v727_v14 = vmax.f32 %v725_v9, %v726_v10  ;;  %v744_v15 = vmax.f32 %v742_v11, %v743_v13  ;;  %v1886_v16 = vpop.f32.mrf.mxu0  ;;  %v1888_v17 = vpop.f32.mrf.mxu1 }
 0x185   : > { %v728_v18 = vrot.slane %v727_v14, 1  ;;  %v745_v19 = vrot.slane %v744_v15, 4 }
 0x187   : > { %v729_v21 = vmax.f32 %v727_v14, %v728_v18  ;;  %v746_v22 = vmax.f32 %v744_v15, %v745_v19  ;;  %v667_v19 = vsel %vm666_vm3, %v1879_v3, -inf }
 0x189   : > { %v1893_v23 = vmax.f32 %v1890_v20, %v729_v21  ;;  %v747_v24 = vrot.slane %v746_v22, 2  ;;  %v688_v21 = vsel %vm666_vm3, %v1888_v17, -inf }
 0x18b   : > { %v773_v25 = vperm.slane %v1893_v23, 0  ;;  %1295 = vst.msk [vmem:[#allocation2 + $0x2] sm:$0x1] %vm394_vm2, %v1893_v23  ;;  %v748_v26 = vmax.f32 %v746_v22, %v747_v24  ;;  %v1898_v27 = vpop.f32.mrf.mxu0  ;;  %v1900_v33 = vpop.f32.mrf.mxu1 }
 0x18d   : > { %v802_v41 = vsub.f32 %v599_v61, %v773_v25  ;;  %v749_v42 = vrot.slane %v748_v26, 1  ;;  %v801_v44 = vsub.f32 %v597_v46, %v773_v25  ;;  %v799_v45 = vsub.f32 %v1843_v36, %v773_v25 }
 0x18e   : > { %v800_v48 = vsub.f32 %v1847_v38, %v773_v25  ;;  %v797_v49 = vsub.f32 %v1831_v31, %v773_v25  ;;  %v798_v52 = vsub.f32 %v1839_v34, %v773_v25  ;;  %v795_v53 = vsub.f32 %v1825_v28, %v773_v25 }
 0x18f   : > { %v834_v50 = vpack.c.bf16 %v802_v41, %v802_v41  ;;  %v750_v51 = vmax.f32 %v748_v26, %v749_v42  ;;  %v833_v54 = vpack.c.bf16 %v801_v44, %v801_v44  ;;  %v831_v55 = vpack.c.bf16 %v799_v45, %v799_v45 }
 0x190   : > { %v832_v56 = vpack.c.bf16 %v800_v48, %v800_v48  ;;  %v829_v46 = vpack.c.bf16 %v797_v49, %v797_v49  ;;  %v830_v31 = vpack.c.bf16 %v798_v52, %v798_v52  ;;  %v796_v1 = vsub.f32 %v1827_v29, %v773_v25 }
 0x191   : > { %v866_v36 = vunpack.c.l.bf16 %v834_v50  ;;  %v1915_v38 = vmax.f32 %v1904_v43, %v750_v51  ;;  %v865_v57 = vunpack.c.l.bf16 %v833_v54  ;;  %v863_v58 = vunpack.c.l.bf16 %v831_v55 }
 0x192   : > { %v864_v34 = vunpack.c.l.bf16 %v832_v56  ;;  %v861_v59 = vunpack.c.l.bf16 %v829_v46  ;;  %v862_v0 = vunpack.c.l.bf16 %v830_v31  ;;  %v827_v5 = vpack.c.bf16 %v795_v53, %v795_v53 }
 0x193   : > { %v921_v28 = vmul.f32 1.442695, %v866_v36  ;;  %v1920_v60 = vperm.slane %v1915_v38, 0  ;;  %1296 = vst.msk [vmem:[#allocation2 + $0x3] sm:$0x1] %vm394_vm2, %v1915_v38  ;;  %v1924_v61 = vpop.f32.mrf.mxu0  ;;  %v1926_v63 = vpop.f32.mrf.mxu1  ;;  %v828_v13 = vpack.c.bf16 %v796_v1, %v796_v1  ;;  %v668_v29 = vsel %vm666_vm3, %v1886_v16, -inf }
 0x194   : > { %v919_v2 = vmul.f32 1.442695, %v865_v57  ;;  %v915_v4 = vmul.f32 1.442695, %v863_v58  ;;  %v917_v7 = vmul.f32 1.442695, %v864_v34  ;;  %v859_v14 = vunpack.c.l.bf16 %v827_v5 }
 0x195   : > { %1632 = vpow2.f32 %v921_v28  ;;  %v810_v6 = vsub.f32 %v659_v12, %v1920_v60  ;;  %v911_v8 = vmul.f32 1.442695, %v861_v59  ;;  %v913_v9 = vmul.f32 1.442695, %v862_v0 }
 0x196   : > { %1634 = vpow2.f32 %v919_v2  ;;  %v809_v11 = vsub.f32 %v1874_v62, %v1920_v60  ;;  %v860_v18 = vunpack.c.l.bf16 %v828_v13  ;;  %v907_v22 = vmul.f32 1.442695, %v859_v14 }
 0x197   : > { %v842_v10 = vpack.c.bf16 %v810_v6, %v810_v6  ;;  %1636 = vpow2.f32 %v915_v4  ;;  %v669_v25 = vmax.f32 %v667_v19, %v668_v29  ;;  %v670_v45 = vsel %vm666_vm3, %v1898_v27, -inf }
 0x198   : > { %1638 = vpow2.f32 %v917_v7  ;;  %v841_v12 = vpack.c.bf16 %v809_v11, %v809_v11  ;;  %v909_v42 = vmul.f32 1.442695, %v860_v18  ;;  %v689_v48 = vsel %vm666_vm3, %v1900_v33, -inf }
 0x199   : > { %v874_v15 = vunpack.c.l.bf16 %v842_v10  ;;  %1640 = vpow2.f32 %v911_v8  ;;  %v672_v51 = vsel %vm666_vm3, %v1924_v61, -inf  ;;  %v691_v52 = vsel %vm666_vm3, %v1926_v63, -inf }
 0x19a   : > { %1642 = vpow2.f32 %v913_v9  ;;  %v873_v41 = vunpack.c.l.bf16 %v841_v12  ;;  %v807_v46 = vsub.f32 %v1849_v39, %v1920_v60  ;;  %v808_v36 = vsub.f32 %v1859_v47, %v1920_v60 }
 0x19b   : > { %v1633_v24 = vpop.eup %1632  ;;  %v937_v62 = vmul.f32 1.442695, %v874_v15  ;;  %v1939_v26 = vpop.f32.mrf.mxu0  ;;  %1644 = vpow2.f32 %v907_v22  ;;  %v671_v28 = vmax.f32 %v669_v25, %v670_v45  ;;  %v690_v0 = vmax.f32 %v688_v21, %v689_v48 }
 0x19c   : > { %v1941_v40 = vpop.f32.mrf.mxu1  ;;  %v1635_v44 = vpop.eup %1634  ;;  %v1947_v49 = vpack.c.bf16 %v1633_v24, %v1633_v24  ;;  %v935_v34 = vmul.f32 1.442695, %v873_v41  ;;  %v674_v1 = vsel %vm666_vm3, %v1939_v26, -inf  ;;  %v757_v10 = vsub.f32 %v1890_v20, %v1893_v23 }
 0x19d   : > { %v1637_v50 = vpop.eup %1636  ;;  %1646 = vpow2.f32 %v937_v62  ;;  %v1953_v53 = vpack.c.bf16 %v1635_v44, %v1635_v44  ;;  %v1969_v39 = vsel %vm666_vm3, %v1941_v40, -inf  ;;  %v673_v7 = vmax.f32 %v671_v28, %v672_v51 }
 0x19e   : > { %v1639_v54 = vpop.eup %1638  ;;  %v1219_v55 = vunpack.c.l.b16 %v1947_v49  ;;  %v1956_v56 = vpack.c.bf16 %v1637_v50, %v1637_v50  ;;  %1648 = vpow2.f32 %v909_v42  ;;  %v1973_v8 = vmax.f32 %v690_v0, %v691_v52 }
 0x19f   : > { %v1641_v31 = vpop.eup %1640  ;;  %v1218_v57 = vunpack.c.l.b16 %v1953_v53  ;;  %v1963_v58 = vpack.c.bf16 %v1639_v54, %v1639_v54  ;;  %1650 = vpow2.f32 %v935_v34  ;;  %v839_v15 = vpack.c.bf16 %v807_v46, %v807_v46 }
 0x1a0   : > { %v1643_v59 = vpop.eup %1642  ;;  %v957_v2 = vpack.c.bf16 %v1641_v31, %v1641_v31  ;;  %v1216_v47 = vunpack.c.l.b16 %v1956_v56  ;;  %v840_v12 = vpack.c.bf16 %v808_v36, %v808_v36  ;;  %v1981_v18 = vmax.f32 %v673_v7, %v674_v1 }
 0x1a1   : > { %v1223_v4 = vpack.c.b16 %v1219_v55, %v1218_v57  ;;  %v1217_v5 = vunpack.c.l.b16 %v1963_v58  ;;  %v1645_v6 = vpop.eup %1644  ;;  %v958_v9 = vpack.c.bf16 %v1643_v59, %v1643_v59  ;;  %v694_v19 = vmax.f32 %v1973_v8, %v1969_v39 }
 0x1a2   : > { %v955_v14 = vpack.c.bf16 %v1645_v6, %v1645_v6  ;;  %v1214_v21 = vunpack.c.l.b16 %v957_v2  ;;  %v805_v22 = vsub.f32 %v1841_v35, %v1920_v60  ;;  %v1001_v62 = vunpack.c.l.bf16 %v1953_v53 }
 0x1a3   : > { %v1647_v11 = vpop.eup %1646  ;;  %1235 = vmatpush.bf16.msrb.mxu2 %v1223_v4  ;;  %v1977_v13 = vpop.f32.mrf.mxu0  ;;  %v1002_v25 = vunpack.c.l.bf16 %v1947_v49  ;;  %v1222_v41 = vpack.c.b16 %v1217_v5, %v1216_v47  ;;  %v1215_v42 = vunpack.c.l.b16 %v958_v9  ;;  %v999_v44 = vunpack.c.l.bf16 %v1956_v56 }
 0x1a4   : > { %v1979_v29 = vpop.f32.mrf.mxu1  ;;  %v1649_v24 = vpop.eup %1648  ;;  %v1990_v45 = vpack.c.bf16 %v1647_v11, %v1647_v11  ;;  %v995_v50 = vunpack.c.l.bf16 %v955_v14  ;;  %v997_v51 = vunpack.c.l.bf16 %v957_v2  ;;  %v998_v52 = vunpack.c.l.bf16 %v958_v9 }
 0x1a5   : > { %v956_v48 = vpack.c.bf16 %v1649_v24, %v1649_v24  ;;  %v1212_v54 = vunpack.c.l.b16 %v955_v14  ;;  %v871_v55 = vunpack.c.l.bf16 %v839_v15  ;;  %v1221_v46 = vpack.c.b16 %v1215_v42, %v1214_v21  ;;  %v1651_v31 = vpop.eup %1650 }
 0x1a6   : > { %v1053_v36 = vsel %vm666_vm3, %v995_v50, 0.0  ;;  %v872_v53 = vunpack.c.l.bf16 %v840_v12  ;;  %v806_v56 = vsub.f32 %v1845_v37, %v1920_v60  ;;  %v837_v59 = vpack.c.bf16 %v805_v22, %v805_v22 }
 0x1a7   : > { %1236 = vmatpush.bf16.msrb.mxu2 %v1222_v41  ;;  %v996_v35 = vunpack.c.l.bf16 %v956_v48  ;;  %v1213_v57 = vunpack.c.l.b16 %v956_v48  ;;  %v931_v34 = vmul.f32 1.442695, %v871_v55  ;;  %v1995_v28 = vpack.c.bf16 %v1651_v31, %v1651_v31  ;;  %v1552_v48 = vld [vmem:[%s2011_s10 + $0x14] sm:$0x3] }
 0x1a8   : > { %v1259_v0 = vunpack.c.l.b16 %v1990_v45  ;;  %v933_v2 = vmul.f32 1.442695, %v872_v53  ;;  %v838_v6 = vpack.c.bf16 %v806_v56, %v806_v56  ;;  %v869_v7 = vunpack.c.l.bf16 %v837_v59 }
 0x1a9   : > { %v1054_v1 = vsel %vm666_vm3, %v996_v35, 0.0  ;;  %1652 = vpow2.f32 %v931_v34  ;;  %v1064_v37 = vsel %vm666_vm3, %v1001_v62, 0.0  ;;  %v1000_v9 = vunpack.c.l.bf16 %v1963_v58 }
 0x1aa   : > { %v1055_v5 = vadd.f32 %v1054_v1, %v1053_v36  ;;  %v1056_v11 = vsel %vm666_vm3, %v997_v51, 0.0  ;;  %v1258_v14 = vunpack.c.l.b16 %v1995_v28  ;;  %v676_v15 = vsel %vm666_vm3, %v1977_v13, -inf }
 0x1ab   : > { %1237 = vmatpush.bf16.msrb.mxu2 %v1221_v46  ;;  %v1999_v4 = vpop.f32.mrf.mxu0  ;;  %v1220_v21 = vpack.c.b16 %v1213_v57, %v1212_v54  ;;  %1654 = vpow2.f32 %v933_v2  ;;  %v1058_v22 = vsel %vm666_vm3, %v998_v52, 0.0  ;;  %v870_v58 = vunpack.c.l.bf16 %v838_v6 }
 0x1ac   : > { %v2001_v47 = vpop.f32.mrf.mxu1  ;;  %v1057_v12 = vadd.f32 %v1056_v11, %v1055_v5  ;;  %v1263_v24 = vpack.c.b16 %v1259_v0, %v1258_v14  ;;  %v927_v62 = vmul.f32 1.442695, %v869_v7  ;;  %v1060_v41 = vsel %vm666_vm3, %v999_v44, 0.0 }
 0x1ad   : > { %v803_v50 = vsub.f32 %v1829_v30, %v1920_v60  ;;  %v804_v51 = vsub.f32 %v1833_v32, %v1920_v60  ;;  %v678_v54 = vsel %vm666_vm3, %v1999_v4, -inf  ;;  %v929_v52 = vmul.f32 1.442695, %v870_v58 }
 0x1ae   : > { %v1059_v42 = vadd.f32 %v1058_v22, %v1057_v12  ;;  %1275 = vmatpush.bf16.msrb.mxu3 %v1263_v24  ;;  %1656 = vpow2.f32 %v927_v62  ;;  %v758_v55 = vsub.f32 %v1904_v43, %v1915_v38  ;;  %v677_v44 = vmax.f32 %v1981_v18, %v676_v15 }
 0x1af   : > { %1238 = vmatpush.bf16.msrb.mxu2 %v1220_v21  ;;  %v1653_v46 = vpop.eup %1652  ;;  %v835_v36 = vpack.c.bf16 %v803_v50, %v803_v50  ;;  %v836_v53 = vpack.c.bf16 %v804_v51, %v804_v51  ;;  %v1062_v30 = vsel %vm666_vm3, %v1000_v9, 0.0  ;;  %1658 = vpow2.f32 %v929_v52 }
 0x1b0   : > { %v1061_v35 = vadd.f32 %v1060_v41, %v1059_v42  ;;  %v2028_v31 = vpack.c.bf16 %v1653_v46, %v1653_v46  ;;  %v763_v32 = vmul.f32 1.442695, %v757_v10  ;;  %v695_v57 = vsel %vm666_vm3, %v1979_v29, -inf }
 0x1b1   : > { %v1655_v60 = vpop.eup %1654  ;;  %v679_v34 = vmax.f32 %v677_v44, %v678_v54  ;;  %v867_v0 = vunpack.c.l.bf16 %v835_v36  ;;  %v868_v20 = vunpack.c.l.bf16 %v836_v53  ;;  %v1066_v23 = vsel %vm666_vm3, %v1002_v25, 0.0  ;;  %v973_v53 = vld [vmem:[#allocation3 + $0x2] sm:$0x1] }
 0x1b2   : > { %1572 = vmatmul.msk.bf16.vlgmr.msrb.gmra.mxu2 %vm666_vm3, %v1552_v48  ;;  %v1063_v18 = vadd.f32 %v1062_v30, %v1061_v35  ;;  %v2040_v1 = vpack.c.bf16 %v1655_v60, %v1655_v60  ;;  %v1256_v2 = vunpack.c.l.b16 %v2028_v31  ;;  %v696_v11 = vmax.f32 %v694_v19, %v695_v57 }
 0x1b3   : > { %v2036_v56 = vpop.f32.mrf.mxu0  ;;  %v923_v7 = vmul.f32 1.442695, %v867_v0  ;;  %v697_v14 = vsel %vm666_vm3, %v2001_v47, -inf  ;;  %1660 = vpow2.f32 %v763_v32  ;;  %v925_v24 = vmul.f32 1.442695, %v868_v20 }
 0x1b4   : > { %v2038_v59 = vpop.f32.mrf.mxu1  ;;  %v680_v5 = vsel %vm666_vm3, %v2036_v56, -inf  ;;  %v1065_v10 = vadd.f32 %v1064_v37, %v1063_v18  ;;  %v1657_v9 = vpop.eup %1656  ;;  %v1257_v15 = vunpack.c.l.b16 %v2040_v1  ;;  %v698_v58 = vmax.f32 %v696_v11, %v697_v14 }
 0x1b5   : > { %v681_v6 = vmax.f32 %v679_v34, %v680_v5  ;;  %v2054_v21 = vpack.c.bf16 %v1657_v9, %v1657_v9  ;;  %1662 = vpow2.f32 %v923_v7  ;;  %v1659_v25 = vpop.eup %1658  ;;  %v699_v22 = vsel %vm666_vm3, %v2038_v59, -inf  ;;  %v2070_v7 = vld [vmem:[#allocation2] sm:$0x1] }
 0x1b6   : > { %v1067_v12 = vadd.f32 %v1066_v23, %v1065_v10  ;;  %v1262_v37 = vpack.c.b16 %v1257_v15, %v1256_v2  ;;  %v966_v8 = vpack.c.bf16 %v1659_v25, %v1659_v25  ;;  %1664 = vpow2.f32 %v925_v24 }
 0x1b7   : > { %v682_v49 = vrot.slane %v681_v6, 4  ;;  %v1254_v19 = vunpack.c.l.b16 %v2054_v21  ;;  %v700_v48 = vmax.f32 %v698_v58, %v699_v22  ;;  %v1010_v30 = vunpack.c.l.bf16 %v1990_v45 }
 0x1b8   : > { %v1068_v39 = vrot.slane %v1067_v12, 4  ;;  %1276 = vmatpush.bf16.msrb.mxu3 %v1262_v37  ;;  %v1255_v42 = vunpack.c.l.b16 %v966_v8  ;;  %v1009_v57 = vunpack.c.l.bf16 %v1995_v28  ;;  %v1007_v18 = vunpack.c.l.bf16 %v2028_v31 }
 0x1b9   : > { %v683_v62 = vmax.f32 %v681_v6, %v682_v49  ;;  %v2061_v51 = vpop.eup %1660  ;;  %v1008_v5 = vunpack.c.l.bf16 %v2040_v1  ;;  %v1005_v28 = vunpack.c.l.bf16 %v2054_v21  ;;  %v1006_v14 = vunpack.c.l.bf16 %v966_v8 }
 0x1ba   : > { %v1069_v41 = vadd.f32 %v1068_v39, %v1067_v12  ;;  %v1261_v35 = vpack.c.b16 %v1255_v42, %v1254_v19  ;;  %v977_v10 = vmul.f32 %v2061_v51, %v973_v53  ;;  %v1085_v37 = vsel %vm666_vm3, %v1009_v57, 0.0 }
 0x1bb   : > { %v684_v54 = vrot.slane %v683_v62, 2  ;;  %v1663_v46 = vpop.eup %1662  ;;  %v1087_v22 = vsel %vm666_vm3, %v1010_v30, 0.0  ;;  %v765_v21 = vmul.f32 1.442695, %v758_v55  ;;  %v1079_v43 = vsel %vm666_vm3, %v1006_v14, 0.0 }
 0x1bc   : > { %v2059_v50 = vpop.f32.mrf.mxu1  ;;  %v1070_v44 = vrot.slane %v1069_v41, 2  ;;  %v963_v60 = vpack.c.bf16 %v1663_v46, %v1663_v46  ;;  %1277 = vmatpush.bf16.msrb.mxu3 %v1261_v35  ;;  %v1665_v2 = vpop.eup %1664 }
 0x1bd   : > { %v701_v52 = vsel %vm666_vm3, %v2059_v50, -inf  ;;  %v685_v32 = vmax.f32 %v683_v62, %v684_v54  ;;  %v964_v45 = vpack.c.bf16 %v1665_v2, %v1665_v2  ;;  %v1081_v62 = vsel %vm666_vm3, %v1007_v18, 0.0 }
 0x1be   : > { %v702_v36 = vmax.f32 %v700_v48, %v701_v52  ;;  %v1071_v34 = vadd.f32 %v1070_v44, %v1069_v41  ;;  %v1003_v23 = vunpack.c.l.bf16 %v963_v60  ;;  %v1252_v9 = vunpack.c.l.b16 %v963_v60  ;;  %v1553_v48 = vld [vmem:[%s2011_s10 + $0x16] sm:$0x3]  ;;  %v2093_v44 = vld [vmem:[#allocation2 + $0x1] sm:$0x1] }
 0x1bf   : > { %v686_v20 = vrot.slane %v685_v32, 1  ;;  %v1004_v49 = vunpack.c.l.bf16 %v964_v45  ;;  %v1253_v1 = vunpack.c.l.b16 %v964_v45  ;;  %v1083_v54 = vsel %vm666_vm3, %v1008_v5, 0.0 }
 0x1c0   : > { %v703_v0 = vrot.slane %v702_v36, 4  ;;  %v1072_v6 = vrot.slane %v1071_v34, 1  ;;  %v1074_v31 = vsel %vm666_vm3, %v1003_v23, 0.0  ;;  %v1077_v52 = vsel %vm666_vm3, %v1005_v28, 0.0 }
 0x1c1   : > { %v687_v15 = vmax.f32 %v685_v32, %v686_v20  ;;  %v1075_v58 = vsel %vm666_vm3, %v1004_v49, 0.0  ;;  %v1260_v39 = vpack.c.b16 %v1253_v1, %v1252_v9  ;;  %1666 = vpow2.f32 %v765_v21 }
 0x1c2   : > { %v704_v11 = vmax.f32 %v702_v36, %v703_v0  ;;  %v1073_v12 = vadd.f32 %v1072_v6, %v1071_v34  ;;  %v1076_v42 = vadd.f32 %v1075_v58, %v1074_v31 }
 0x1c3   : > { %v2077_v24 = vmax.f32 %v2070_v7, %v687_v15  ;;  %1278 = vmatpush.bf16.msrb.mxu3 %v1260_v39 }
 0x1c4   : > { %v705_v25 = vrot.slane %v704_v11, 2  ;;  %v1097_v19 = vadd.f32 %v1073_v12, %v977_v10  ;;  %v1078_v46 = vadd.f32 %v1077_v52, %v1076_v42 }
 0x1c5   : > { %v771_v41 = vperm.slane %v2077_v24, 0  ;;  %1293 = vst.msk [vmem:[#allocation2] sm:$0x1] %vm394_vm2, %v2077_v24 }
 0x1c6   : > { %v706_v8 = vmax.f32 %v704_v11, %v705_v25  ;;  %1102 = vst.msk [vmem:[#allocation3 + $0x2] sm:$0x1] %vm394_vm2, %v1097_v19  ;;  %v1080_v34 = vadd.f32 %v1079_v43, %v1078_v46  ;;  %1573 = vmatmul.msk.bf16.vlgmr.msrb.gmra.mxu3 %vm666_vm3, %v1553_v48 }
 0x1c7   : > { %v786_v55 = vsub.f32 %v2036_v56, %v771_v41  ;;  %v785_v35 = vsub.f32 %v1999_v4, %v771_v41  ;;  %v783_v36 = vsub.f32 %v1939_v26, %v771_v41  ;;  %v784_v30 = vsub.f32 %v1977_v13, %v771_v41 }
 0x1c8   : > { %v707_v38 = vrot.slane %v706_v8, 1  ;;  %v781_v32 = vsub.f32 %v1898_v27, %v771_v41  ;;  %v782_v60 = vsub.f32 %v1924_v61, %v771_v41  ;;  %v1082_v20 = vadd.f32 %v1081_v62, %v1080_v34 }
 0x1c9   : > { %v818_v57 = vpack.c.bf16 %v786_v55, %v786_v55  ;;  %v817_v18 = vpack.c.bf16 %v785_v35, %v785_v35  ;;  %v815_v56 = vpack.c.bf16 %v783_v36, %v783_v36  ;;  %v816_v2 = vpack.c.bf16 %v784_v30, %v784_v30 }
 0x1ca   : > { %v708_v53 = vmax.f32 %v706_v8, %v707_v38  ;;  %v813_v4 = vpack.c.bf16 %v781_v32, %v781_v32  ;;  %v814_v5 = vpack.c.bf16 %v782_v60, %v782_v60  ;;  %v1084_v9 = vadd.f32 %v1083_v54, %v1082_v20  ;;  %v2115_v54 = vpop.eup %1666 }
 0x1cb   : > { %v850_v26 = vunpack.c.l.bf16 %v818_v57  ;;  %v849_v23 = vunpack.c.l.bf16 %v817_v18  ;;  %v847_v13 = vunpack.c.l.bf16 %v815_v56  ;;  %v848_v61 = vunpack.c.l.bf16 %v816_v2 }
 0x1cc   : > { %v2102_v0 = vmax.f32 %v2093_v44, %v708_v53  ;;  %v845_v10 = vunpack.c.l.bf16 %v813_v4  ;;  %v846_v6 = vunpack.c.l.bf16 %v814_v5  ;;  %v1086_v12 = vadd.f32 %v1085_v37, %v1084_v9 }
 0x1cd   : > { %v889_v45 = vmul.f32 1.442695, %v850_v26  ;;  %v887_v11 = vmul.f32 1.442695, %v849_v23  ;;  %v883_v28 = vmul.f32 1.442695, %v847_v13  ;;  %v779_v1 = vsub.f32 %v1879_v3, %v771_v41 }
 0x1ce   : > { %v2105_v27 = vperm.slane %v2102_v0, 0  ;;  %1294 = vst.msk [vmem:[#allocation2 + $0x1] sm:$0x1] %vm394_vm2, %v2102_v0  ;;  %v885_v15 = vmul.f32 1.442695, %v848_v61  ;;  %v780_v39 = vsub.f32 %v1886_v16, %v771_v41  ;;  %v1088_v8 = vadd.f32 %v1087_v22, %v1086_v12 }
 0x1cf   : > { %v879_v31 = vmul.f32 1.442695, %v845_v10  ;;  %1668 = vpow2.f32 %v889_v45  ;;  %v881_v58 = vmul.f32 1.442695, %v846_v6  ;;  %v811_v62 = vpack.c.bf16 %v779_v1, %v779_v1  ;;  %v974_v1 = vld [vmem:[#allocation3 + $0x3] sm:$0x1] }
 0x1d0   : > { %v794_v14 = vsub.f32 %v2059_v50, %v2105_v27  ;;  %v793_v49 = vsub.f32 %v2038_v59, %v2105_v27  ;;  %1670 = vpow2.f32 %v887_v11  ;;  %v812_v42 = vpack.c.bf16 %v780_v39, %v780_v39 }
 0x1d1   : > { %1672 = vpow2.f32 %v883_v28  ;;  %v1089_v21 = vrot.slane %v1088_v8, 4  ;;  %v843_v48 = vunpack.c.l.bf16 %v811_v62  ;;  %v791_v3 = vsub.f32 %v1979_v29, %v2105_v27 }
 0x1d2   : > { %v826_v25 = vpack.c.bf16 %v794_v14, %v794_v14  ;;  %v825_v19 = vpack.c.bf16 %v793_v49, %v793_v49  ;;  %1674 = vpow2.f32 %v885_v15  ;;  %v792_v43 = vsub.f32 %v2001_v47, %v2105_v27 }
 0x1d3   : > { %1676 = vpow2.f32 %v879_v31  ;;  %v1090_v16 = vadd.f32 %v1089_v21, %v1088_v8  ;;  %v875_v41 = vmul.f32 1.442695, %v843_v48  ;;  %v844_v53 = vunpack.c.l.bf16 %v812_v42 }
 0x1d4   : > { %v858_v50 = vunpack.c.l.bf16 %v826_v25  ;;  %v857_v37 = vunpack.c.l.bf16 %v825_v19  ;;  %1678 = vpow2.f32 %v881_v58  ;;  %v823_v60 = vpack.c.bf16 %v791_v3, %v791_v3 }
 0x1d5   : > { %v1669_v52 = vpop.eup %1668  ;;  %v1091_v35 = vrot.slane %v1090_v16, 2  ;;  %v824_v56 = vpack.c.bf16 %v792_v43, %v792_v43  ;;  %v877_v20 = vmul.f32 1.442695, %v844_v53  ;;  %v978_v42 = vmul.f32 %v2115_v54, %v974_v1 }
 0x1d6   : > { %v905_v59 = vmul.f32 1.442695, %v858_v50  ;;  %v903_v22 = vmul.f32 1.442695, %v857_v37  ;;  %v1671_v38 = vpop.eup %1670  ;;  %v2121_v55 = vpack.c.bf16 %v1669_v52, %v1669_v52  ;;  %v855_v10 = vunpack.c.l.bf16 %v823_v60 }
 0x1d7   : > { %v1673_v46 = vpop.eup %1672  ;;  %v2123_v36 = vpack.c.bf16 %v1671_v38, %v1671_v38  ;;  %v1092_v34 = vadd.f32 %v1091_v35, %v1090_v16  ;;  %v856_v11 = vunpack.c.l.bf16 %v824_v56  ;;  %v789_v50 = vsub.f32 %v1926_v63, %v2105_v27 }
 0x1d8   : > { %1680 = vpow2.f32 %v905_v59  ;;  %v1675_v30 = vpop.eup %1674  ;;  %v1139_v29 = vunpack.c.l.b16 %v2121_v55  ;;  %v2126_v32 = vpack.c.bf16 %v1673_v46, %v1673_v46  ;;  %v899_v58 = vmul.f32 1.442695, %v855_v10 }
 0x1d9   : > { %1682 = vpow2.f32 %v903_v22  ;;  %v1677_v57 = vpop.eup %1676  ;;  %v1138_v47 = vunpack.c.l.b16 %v2123_v36  ;;  %v2129_v18 = vpack.c.bf16 %v1675_v30, %v1675_v30  ;;  %v1093_v45 = vrot.slane %v1092_v34, 1 }
 0x1da   : > { %1684 = vpow2.f32 %v875_v41  ;;  %v1679_v2 = vpop.eup %1678  ;;  %v2131_v4 = vpack.c.bf16 %v1677_v57, %v1677_v57  ;;  %v1136_v26 = vunpack.c.l.b16 %v2126_v32  ;;  %v901_v19 = vmul.f32 1.442695, %v856_v11 }
 0x1db   : > { %v1143_v5 = vpack.c.b16 %v1139_v29, %v1138_v47  ;;  %v1137_v13 = vunpack.c.l.b16 %v2129_v18  ;;  %v2135_v61 = vpack.c.bf16 %v1679_v2, %v1679_v2  ;;  %1686 = vpow2.f32 %v877_v20 }
 0x1dc   : > { %v1134_v14 = vunpack.c.l.b16 %v2131_v4  ;;  %v1094_v39 = vadd.f32 %v1093_v45, %v1092_v34  ;;  %1688 = vpow2.f32 %v899_v58  ;;  %v790_v48 = vsub.f32 %v1941_v40, %v2105_v27 }
 0x1dd   : > { %1155 = vmatpush.bf16.msrb.mxu0 %v1143_v5  ;;  %v1135_v15 = vunpack.c.l.b16 %v2135_v61  ;;  %v1142_v31 = vpack.c.b16 %v1137_v13, %v1136_v26  ;;  %1690 = vpow2.f32 %v901_v19  ;;  %v821_v59 = vpack.c.bf16 %v789_v50, %v789_v50 }
 0x1de   : > { %v1681_v23 = vpop.eup %1680  ;;  %v787_v3 = vsub.f32 %v1888_v17, %v2105_v27  ;;  %v788_v52 = vsub.f32 %v1900_v33, %v2105_v27  ;;  %v822_v63 = vpack.c.bf16 %v790_v48, %v790_v48  ;;  %v1098_v41 = vadd.f32 %v1094_v39, %v978_v42 }
 0x1df   : > { %v1683_v6 = vpop.eup %1682  ;;  %v2137_v9 = vpack.c.bf16 %v1681_v23, %v1681_v23  ;;  %v1141_v62 = vpack.c.b16 %v1135_v15, %v1134_v14  ;;  %v853_v38 = vunpack.c.l.bf16 %v821_v59  ;;  %v981_v53 = vunpack.c.l.bf16 %v2131_v4 }
 0x1e0   : > { %v1685_v28 = vpop.eup %1684  ;;  %v2141_v12 = vpack.c.bf16 %v1683_v6, %v1683_v6  ;;  %v819_v46 = vpack.c.bf16 %v787_v3, %v787_v3  ;;  %v820_v35 = vpack.c.bf16 %v788_v52, %v788_v52  ;;  %v854_v30 = vunpack.c.l.bf16 %v822_v63  ;;  %1103 = vst.msk [vmem:[#allocation3 + $0x3] sm:$0x1] %vm394_vm2, %v1098_v41  ;;  %v1550_v6 = vld [vmem:[%s2011_s10 + $0x10] sm:$0x3] }
 0x1e1   : > { %v1179_v49 = vunpack.c.l.b16 %v2137_v9  ;;  %v939_v25 = vpack.c.bf16 %v1685_v28, %v1685_v28  ;;  %1156 = vmatpush.bf16.msrb.mxu0 %v1142_v31  ;;  %v1687_v16 = vpop.eup %1686  ;;  %v895_v27 = vmul.f32 1.442695, %v853_v38  ;;  %v982_v34 = vunpack.c.l.bf16 %v2135_v61 }
 0x1e2   : > { %v1178_v8 = vunpack.c.l.b16 %v2141_v12  ;;  %v940_v43 = vpack.c.bf16 %v1687_v16, %v1687_v16  ;;  %v1689_v17 = vpop.eup %1688  ;;  %v851_v60 = vunpack.c.l.bf16 %v819_v46  ;;  %v897_v56 = vmul.f32 1.442695, %v854_v30 }
 0x1e3   : > { %v979_v37 = vunpack.c.l.bf16 %v939_v25  ;;  %v1132_v22 = vunpack.c.l.b16 %v939_v25  ;;  %v1691_v57 = vpop.eup %1690  ;;  %v2158_v47 = vpack.c.bf16 %v1689_v17, %v1689_v17  ;;  %v852_v2 = vunpack.c.l.bf16 %v820_v35 }
 0x1e4   : > { %v1183_v21 = vpack.c.b16 %v1179_v49, %v1178_v8  ;;  %v980_v29 = vunpack.c.l.bf16 %v940_v43  ;;  %v1133_v33 = vunpack.c.l.b16 %v940_v43  ;;  %v2161_v26 = vpack.c.bf16 %v1691_v57, %v1691_v57  ;;  %v1551_v57 = vld [vmem:[%s2011_s10 + $0x12] sm:$0x3] }
 0x1e5   : > { %1157 = vmatpush.bf16.msrb.mxu0 %v1141_v62  ;;  %v1011_v40 = vsel %vm666_vm3, %v979_v37, 0.0  ;;  %1692 = vpow2.f32 %v895_v27  ;;  %v1014_v20 = vsel %vm666_vm3, %v981_v53, 0.0  ;;  %v1176_v13 = vunpack.c.l.b16 %v2158_v47 }
 0x1e6   : > { %1195 = vmatpush.bf16.msrb.mxu1 %v1183_v21  ;;  %v1012_v4 = vsel %vm666_vm3, %v980_v29, 0.0  ;;  %v1140_v5 = vpack.c.b16 %v1133_v33, %v1132_v22  ;;  %1694 = vpow2.f32 %v897_v56  ;;  %v983_v10 = vunpack.c.l.bf16 %v2126_v32 }
 0x1e7   : > { %v1013_v23 = vadd.f32 %v1012_v4, %v1011_v40  ;;  %v1177_v61 = vunpack.c.l.b16 %v2161_v26  ;;  %v891_v45 = vmul.f32 1.442695, %v851_v60  ;;  %v893_v11 = vmul.f32 1.442695, %v852_v2 }
 0x1e8   : > { %v984_v14 = vunpack.c.l.bf16 %v2129_v18  ;;  %v1016_v15 = vsel %vm666_vm3, %v982_v34, 0.0  ;;  %v985_v32 = vunpack.c.l.bf16 %v2123_v36  ;;  %v1018_v25 = vsel %vm666_vm3, %v983_v10, 0.0  ;;  %v971_v10 = vld [vmem:[#allocation3] sm:$0x1] }
 0x1e9   : > { %1158 = vmatpush.bf16.msrb.mxu0 %v1140_v5  ;;  %v1015_v28 = vadd.f32 %v1014_v20, %v1013_v23  ;;  %v1182_v31 = vpack.c.b16 %v1177_v61, %v1176_v13  ;;  %1696 = vpow2.f32 %v891_v45  ;;  %v986_v19 = vunpack.c.l.bf16 %v2121_v55 }
 0x1ea   : > { %1698 = vpow2.f32 %v893_v11  ;;  %v1020_v18 = vsel %vm666_vm3, %v984_v14, 0.0  ;;  %v755_v50 = vsub.f32 %v2070_v7, %v2077_v24  ;;  %v1022_v48 = vsel %vm666_vm3, %v985_v32, 0.0 }
 0x1eb   : > { %v1017_v49 = vadd.f32 %v1016_v15, %v1015_v28  ;;  %v1693_v1 = vpop.eup %1692  ;;  %1196 = vmatpush.bf16.msrb.mxu1 %v1182_v31  ;;  %v1024_v16 = vsel %vm666_vm3, %v986_v19, 0.0  ;;  %v991_v27 = vunpack.c.l.bf16 %v2158_v47  ;;  %v992_v2 = vunpack.c.l.bf16 %v2161_v26 }
 0x1ec   : > { %1570 = vmatmul.msk.bf16.vlgmr.msrb.gmra.mxu0 %vm666_vm3, %v1550_v6  ;;  %v1695_v58 = vpop.eup %1694  ;;  %v949_v8 = vpack.c.bf16 %v1693_v1, %v1693_v1  ;;  %v759_v55 = vmul.f32 1.442695, %v755_v50  ;;  %v993_v13 = vunpack.c.l.bf16 %v2141_v12  ;;  %v994_v45 = vunpack.c.l.bf16 %v2137_v9 }
 0x1ed   : > { %v1019_v39 = vadd.f32 %v1018_v25, %v1017_v49  ;;  %v950_v62 = vpack.c.bf16 %v1695_v58, %v1695_v58  ;;  %v1039_v47 = vsel %vm666_vm3, %v991_v27, 0.0  ;;  %v1041_v11 = vsel %vm666_vm3, %v992_v2, 0.0 }
 0x1ee   : > { %v1174_v21 = vunpack.c.l.b16 %v949_v8  ;;  %v989_v46 = vunpack.c.l.bf16 %v949_v8  ;;  %1700 = vpow2.f32 %v759_v55  ;;  %v756_v26 = vsub.f32 %v2093_v44, %v2102_v0  ;;  %v972_v0 = vld [vmem:[#allocation3 + $0x1] sm:$0x1] }
 0x1ef   : > { %v1021_v42 = vadd.f32 %v1020_v18, %v1019_v39  ;;  %v1697_v37 = vpop.eup %1696  ;;  %v1175_v36 = vunpack.c.l.b16 %v950_v62  ;;  %v990_v40 = vunpack.c.l.bf16 %v950_v62  ;;  %v1043_v31 = vsel %vm666_vm3, %v993_v13, 0.0 }
 0x1f0   : > { %v1699_v59 = vpop.eup %1698  ;;  %v947_v52 = vpack.c.bf16 %v1697_v37, %v1697_v37  ;;  %v1035_v60 = vsel %vm666_vm3, %v989_v46, 0.0  ;;  %v1045_v1 = vsel %vm666_vm3, %v994_v45, 0.0  ;;  %v761_v32 = vmul.f32 1.442695, %v756_v26  ;;  %v1335_v26 = vld [vmem:[%s2239_s5 + $0x8] sm:$0xff] }
 0x1f1   : > { %v1023_v3 = vadd.f32 %v1022_v48, %v1021_v42  ;;  %v1181_v22 = vpack.c.b16 %v1175_v36, %v1174_v21  ;;  %v948_v63 = vpack.c.bf16 %v1699_v59, %v1699_v59  ;;  %v1037_v4 = vsel %vm666_vm3, %v990_v40, 0.0  ;;  %v1106_v21 = vld [vmem:[#allocation4 + $0x8] sm:$0xf]  ;;  %v1302_v59 = vld [vmem:[#allocation3 + $0x2] sm:$0x1] }
 0x1f2   : > { %v987_v43 = vunpack.c.l.bf16 %v947_v52  ;;  %v1172_v38 = vunpack.c.l.b16 %v947_v52  ;;  %1702 = vpow2.f32 %v761_v32  ;;  %v1114_v42 = vperm.slane %v2061_v51, 0  ;;  %v1583_v32 = vld [vmem:[%s2238_s4] sm:$0xff] }
 0x1f3   : > { %v1025_v41 = vadd.f32 %v1024_v16, %v1023_v3  ;;  %1197 = vmatpush.bf16.msrb.mxu1 %v1181_v22  ;;  %v988_v7 = vunpack.c.l.bf16 %v948_v63  ;;  %v1173_v24 = vunpack.c.l.b16 %v948_v63  ;;  %1704 = vrcp.f32 %v1302_v59 }
 0x1f4   : > { %v1032_v53 = vsel %vm666_vm3, %v987_v43, 0.0  ;;  %v2187_v23 = vpop.eup %1700  ;;  %v1122_v37 = vmul.f32 %v1114_v42, %v1106_v21  ;;  %v1107_v43 = vld [vmem:[#allocation4 + $0xc] sm:$0xf] }
 0x1f5   : > { %v1026_v35 = vrot.slane %v1025_v41, 4  ;;  %v1033_v30 = vsel %vm666_vm3, %v988_v7, 0.0  ;;  %v1180_v17 = vpack.c.b16 %v1173_v24, %v1172_v38  ;;  %v975_v15 = vmul.f32 %v2187_v23, %v971_v10  ;;  %v1303_v38 = vld [vmem:[#allocation3 + $0x3] sm:$0x1] }
 0x1f6   : > { %v1034_v33 = vadd.f32 %v1033_v30, %v1032_v53  ;;  %1706 = vrcp.f32 %v1303_v38 }
 0x1f7   : > { %v1027_v29 = vadd.f32 %v1026_v35, %v1025_v41  ;;  %1198 = vmatpush.bf16.msrb.mxu1 %v1180_v17  ;;  %v1115_v41 = vperm.slane %v2115_v54, 0 }
 0x1f8   : > { %v1036_v56 = vadd.f32 %v1035_v60, %v1034_v33  ;;  %v1703_v44 = vpop.eup %1702  ;;  %v1104_v33 = vld [vmem:[#allocation4] sm:$0xf] }
 0x1f9   : > { %v1028_v34 = vrot.slane %v1027_v29, 2  ;;  %v976_v62 = vmul.f32 %v1703_v44, %v972_v0  ;;  %v1705_v52 = vpop.eup %1704  ;;  %v1123_v51 = vmul.f32 %v1115_v41, %v1107_v43 }
 0x1fa   : > { %v1038_v20 = vadd.f32 %v1037_v4, %v1036_v56  ;;  %1571 = vmatmul.msk.bf16.vlgmr.msrb.gmra.mxu1 %vm666_vm3, %v1551_v57  ;;  %v1318_v16 = vperm.slane %v1705_v52, 0 }
 0x1fb   : > { %v1029_v5 = vadd.f32 %v1028_v34, %v1027_v29  ;;  %v1112_v29 = vperm.slane %v2187_v23, 0  ;;  %v1105_v23 = vld [vmem:[#allocation4 + $0x4] sm:$0xf] }
 0x1fc   : > { %v1040_v6 = vadd.f32 %v1039_v47, %v1038_v20  ;;  %v1707_v24 = vpop.eup %1706  ;;  %v1113_v20 = vperm.slane %v1703_v44, 0  ;;  %v1738_v47 = vmov 0  }
 0x1fd   : > { %v1030_v61 = vrot.slane %v1029_v5, 1  ;;  %v1319_v53 = vperm.slane %v1707_v24, 0  ;;  %v1120_v27 = vmul.f32 %v1112_v29, %v1104_v33  ;;  %1630 = vset.pattern.permute.xlu1 %v1738_v47  ;;  %1631 = vset.pattern.permute.xlu0 %v1738_v47 }
 0x1fe   : > { %v1042_v14 = vadd.f32 %v1041_v11, %v1040_v6  ;;  %v1121_v6 = vmul.f32 %v1113_v20, %v1105_v23 }
 0x1ff   : > { %v1031_v28 = vadd.f32 %v1030_v61, %v1029_v5  ;;  %v1334_v5 = vld [vmem:[%s2239_s5] sm:$0xff] }
 0x200   : > { %v1044_v49 = vadd.f32 %v1043_v31, %v1042_v14  ;;  %1338 = vperm.xlu1 %1630, %v1334_v5  }
 0x201   : > { %v1095_v12 = vadd.f32 %v1031_v28, %v975_v15 }
 0x202   : > { %v1046_v25 = vadd.f32 %v1045_v1, %v1044_v49 }
 0x203   : > { %1100 = vst.msk [vmem:[#allocation3] sm:$0x1] %vm394_vm2, %v1095_v12 }
 0x204   : > { %v1047_v9 = vrot.slane %v1046_v25, 4 }
 0x206   : > { %v1048_v58 = vadd.f32 %v1047_v9, %v1046_v25 }
 0x208   : > { %v1049_v39 = vrot.slane %v1048_v58, 2  ;;  %1343 = vperm.xlu1 %1630, %v1335_v26  }
 0x20a   : > { %v1050_v8 = vadd.f32 %v1049_v39, %v1048_v58  ;;  %v1300_v54 = vld [vmem:[#allocation3] sm:$0x1]  ;;  %v1382_v58 = vld [vmem:[%s380_s20] sm:$0xff] }
 0x20b   : > { %1708 = vrcp.f32 %v1300_v54 }
 0x20c   : > { %v1051_v19 = vrot.slane %v1050_v8, 1 }
 0x20e   : > { %v1052_v18 = vadd.f32 %v1051_v19, %v1050_v8  ;;  %v1383_v8 = vld [vmem:[%s380_s20 + $0x8] sm:$0xff] }
 0x210   : > { %v1096_v50 = vadd.f32 %v1052_v18, %v976_v62 }
 0x211   : > { %v1709_v34 = vpop.eup %1708 }
 0x212   : > { %1101 = vst.msk [vmem:[#allocation3 + $0x1] sm:$0x1] %vm394_vm2, %v1096_v50  ;;  %v1316_v2 = vperm.slane %v1709_v34, 0 }
 0x219   : > { %v1301_v10 = vld [vmem:[#allocation3 + $0x1] sm:$0x1] }
 0x21a   : > { %1710 = vrcp.f32 %v1301_v10 }
 0x220   : > { %v1711_v28 = vpop.eup %1710 }
 0x221   : > { %v1317_v15 = vperm.slane %v1711_v28, 0 }
 0x235   : > { %v1240_v48 = vpop.f32.mrf.mxu2 }
 0x236   : > { %v1286_v36 = vadd.f32 %v1240_v48, %v1122_v37 }
 0x238   : > { %1291 = vst.msk [vmem:[#allocation4 + $0x8] sm:$0xf] %vm403_vm4, %v1286_v36 }
 0x23d   : > { %v1242_v3 = vpop.f32.mrf.mxu2 }
 0x23f   : > { %v1310_v22 = vld [vmem:[#allocation4 + $0x8] sm:$0xf] }
 0x240   : > { %v1326_v63 = vmul.f32 %v1318_v16, %v1310_v22 }
 0x242   : > { %v1330_v55 = vpack.c.bf16 %v1326_v63, %v1326_v63 }
 0x244   : > { %1358 = vst [vmem:[#allocation1 + $0x2] ss:$4 sm:$0xff] %v1330_v55 }
 0x249   : > { %v1280_v46 = vpop.f32.mrf.mxu3 }
 0x24a   : > { %v1287_v7 = vadd.f32 %v1280_v46, %v1123_v51 }
 0x24c   : > { %1292 = vst.msk [vmem:[#allocation4 + $0xc] sm:$0xf] %vm403_vm4, %v1287_v7 }
 0x251   : > { %v1282_v35 = vpop.f32.mrf.mxu3 }
 0x253   : > { %v1311_v40 = vld [vmem:[#allocation4 + $0xc] sm:$0xf] }
 0x254   : > { %v1327_v30 = vmul.f32 %v1319_v53, %v1311_v40 }
 0x256   : > { %v1331_v17 = vpack.c.bf16 %v1327_v30, %v1327_v30 }
 0x258   : > { %1361 = vst [vmem:[#allocation1 + $0x3] ss:$4 sm:$0xff] %v1331_v17 }
 0x269   : > { %v1160_v60 = vpop.f32.mrf.mxu0 }
 0x26a   : > { %v1284_v57 = vadd.f32 %v1160_v60, %v1120_v27 }
 0x26c   : > { %1289 = vst.msk [vmem:[#allocation4] sm:$0xf] %vm403_vm4, %v1284_v57 }
 0x271   : > { %v1162_v56 = vpop.f32.mrf.mxu0 }
 0x272   : > { %v1339_v25 = vpop.permute.xlu1 %1338 }
 0x273   : > { %v1308_v4 = vld [vmem:[#allocation4] sm:$0xf] }
 0x274   : > { %v1324_v13 = vmul.f32 %v1316_v2, %v1308_v4 }
 0x276   : > { %v1328_v61 = vpack.c.bf16 %v1324_v13, %v1324_v13 }
 0x277   : > { %v1200_v45 = vpop.f32.mrf.mxu1 }
 0x278   : > { %1352 = vst [vmem:[#allocation1] ss:$4 sm:$0xff] %v1328_v61  ;;  %v1285_v11 = vadd.f32 %v1200_v45, %v1121_v6 }
 0x27a   : > { %1290 = vst.msk [vmem:[#allocation4 + $0x4] sm:$0xf] %vm403_vm4, %v1285_v11  ;;  %v1344_v0 = vpop.permute.xlu1 %1343 }
 0x27f   : > { %v1202_v14 = vpop.f32.mrf.mxu1 }
 0x281   : > { %v1309_v31 = vld [vmem:[#allocation4 + $0x4] sm:$0xf] }
 0x282   : > { %v1325_v49 = vmul.f32 %v1317_v15, %v1309_v31 }
 0x284   : > { %v1329_v12 = vpack.c.bf16 %v1325_v49, %v1325_v49 }
 0x286   : > { %1355 = vst [vmem:[#allocation1 + $0x1] ss:$4 sm:$0xff] %v1329_v12 }
 0x28d   : > { %v1362_v1 = vld.sshfl [vmem:[#allocation1] sm:$0xff pattern:$0x73625140] }
 0x28e   : > { %1375 = vmatpush.bf16.msra.mxu0 %v1362_v1 }
 0x291   : > { %1578 = vmatmul.msk.bf16.vlgmr.msra.gmra.mxu0 %vm1364_vm5, %v1583_v32 }
 0x30e   : > { %v1377_v9 = vpop.f32.mrf.mxu0 }
 0x30f   : > { %v1378_v39 = vadd.f32 %v1377_v9, %v1339_v25 }
 0x311   : > { %v1384_v44 = vadd.f32 %v1382_v58, %v1378_v39 }
 0x313   : > { %1386 = vst.msk [vmem:[%s388_s27] sm:$0xff] %vm666_vm3, %v1384_v44 }
 0x316   : > { %v1379_v19 = vpop.f32.mrf.mxu0 }
 0x317   : > { %v1380_v18 = vadd.f32 %v1379_v19, %v1344_v0 }
 0x319   : > { %v1385_v62 = vadd.f32 %v1383_v8, %v1380_v18 }
 0x31b   : > { %1387 = vst.msk [vmem:[%s388_s27 + $0x8] sm:$0xff] %vm666_vm3, %v1385_v62 }
 0x31c PF: > { %s16_s23 = sadd.s32 1, %s1734_s23   ;;  %s2241_s21 = smov %s1730_s22 }
 0x31d   : > { %p13_p5 = scmp.ge.s32.totalorder %s16_s23, 4   ;;  %s2242_s22 = smov %s2244_s24 }
 0x31f   :  { %15 = sbr.rel (!%p13_p5) target bundleno = 2 (0x2), region = 94 }

</bundles_post_ra>
